<compile_context>
chip_gen: v6e
topology: v6e:2x2x1
jax: 0.10.0
libtpu: 0.0.40
codegen_flags: <defaults>
</compile_context>

<pallas_src>
import functools

import jax
import jax.numpy as jnp
from jax import lax
from jax.experimental import pallas as pl
from jax.experimental.pallas import tpu as pltpu
import numpy as np


# --------------------------- fused Pallas kernel (hot path) ---------------------------

def _decode_fused_kernel(xstk_ref, codecols_ref, w1stk_ref, w2stk_ref, w2d_ref,
                         b1_ref, b2_ref, mask_ref, out_ref, dslab_ref,
                         *, K, Hp, Lc, Lfull, Wm, Wp2, cin):
    f32 = jnp.float32
    offs = [kd * Hp + kh for kd in range(K) for kh in range(K)]        # (kd,kh) lane shifts

    # ---------------- deconv (ConvTranspose3d lowered to a forward conv) -------------
    # acc1[c, l] = sum_{kd,kh} W1[kd,kh] @ xstk[:, l + kd*Hp + kh]   (contraction = Kw*Cin)
    acc1 = None
    for t, off in enumerate(offs):
        part = jnp.dot(w1stk_ref[t], xstk_ref[:, off:off + Lc],
                       preferred_element_type=f32)
        acc1 = part if acc1 is None else acc1 + part
    # bias + ReLU, then zero lanes that are not real (n,d,h) output positions so the
    # result doubles as the zero-padded deconv column of `merge`.
    dmask = jnp.maximum(acc1 + b1_ref[...], 0.0) * mask_ref[...]       # (cin, Lc)

    # Place the deconv column into the padded-merge lane space (merge padded-W slab 1):
    # merge_pad position (n, d+1, h+1) == deconv position (n, d, h) shifted by Hp+1 lanes.
    dslab_ref[...] = jnp.zeros((cin, Lfull), f32)
    dslab_ref[:, Hp + 1:Hp + 1 + Lc] = dmask
    dtaps = [dslab_ref[:, off:off + Lc] for off in offs]               # 9 x (cin, Lc)

    w2 = [w2stk_ref[kw] for kw in range(K)]                            # (cout, 9*cin) each

    # ---------------- conv (padding='same' over merge = [deconv | code]) -------------
    accs = [None] * Wm

    def _add(wm, val):
        accs[wm] = val if accs[wm] is None else accs[wm] + val

    for s in range(Wp2):                        # padded-W slab index of merge
        if s == 1:
            # the only slab that depends on in-kernel data (the deconv column)
            for kw in range(K):
                wm = s - kw
                if 0 <= wm < Wm:
                    contrib = None
                    for t in range(K * K):
                        p = jnp.dot(w2d_ref[kw, t], dtaps[t],
                                    preferred_element_type=f32)
                        contrib = p if contrib is None else contrib + p
                    _add(wm, contrib)
        else:
            cols = codecols_ref[s]              # (9*cin, Lc): (kd,kh)-stacked code slab
            for kw in range(K):
                wm = s - kw
                if 0 <= wm < Wm:
                    _add(wm, jnp.dot(w2[kw], cols, preferred_element_type=f32))

    # ---------- epilogue: bias + ReLU + dropout(eval)=identity + residual add --------
    for wm in range(Wm):
        conv = jnp.maximum(accs[wm] + b2_ref[...], 0.0)
        out_ref[wm] = (conv + dmask).astype(out_ref.dtype)             # deconv broadcast over W


# ------------------------------- JAX wrapper --------------------------------

def decode_layer_forward(x_ncdhw, params):
    K = 3
    w_deconv = params["w_deconv"]      # (Cin, Cin, K, K, K)   PyTorch ConvTranspose3d layout
    b_deconv = params["b_deconv"]      # (Cin,)
    w_conv = params["w_conv"]          # (Cout, Cin, K, K, K)  PyTorch Conv3d layout
    b_conv = params["b_conv"]          # (Cout,)
    code_layer = params["code_layer"]  # (N, Cin, Dd, Hd, Wc)  NCDHW

    N, Cin, Di, Hi, Wi = x_ncdhw.shape
    Cout = w_conv.shape[0]
    Dd, Hd, Wd = Di + 2, 2 * Hi - 1, 2 * Wi - 1
    Wc = code_layer.shape[4]
    Wm = Wd + Wc
    # PyTorch's `deconv + conv` broadcast is only defined under these conditions:
    assert Wd == 1 and Cin == Cout, "residual broadcast requires W_deconv == 1 and Cin == Cout"

    Dp, Hp = Dd + 2, Hd + 2            # padded D/H extents, shared by both convs
    Wp1, Wp2 = Wd + 2, Wm + 2
    Lfull = N * Dp * Hp                # shared flattened (n, d_pad, h_pad) lane space
    Lc = Lfull - (K - 1) * Hp - (K - 1)
    f32 = jnp.float32

    # ---- deconv input: dilate (1,2,2) + pad (2,1,1); W slabs leading, lanes = (n,dp,hp)
    xt = jnp.transpose(x_ncdhw, (4, 1, 0, 2, 3)).astype(f32)       # (Wi, Cin, N, Di, Hi)
    xpad = jnp.zeros((Wp1, Cin, N, Dp, Hp), f32)
    xpad = xpad.at[1:2 * Wi:2, :, :, 2:2 + Di, 1:2 * Hi:2].set(xt)
    xstk = xpad.reshape(Wp1 * Cin, Lfull)                          # (Kw*Cin, Lfull)

    # ---- code part of the padded merge, (kd,kh)-tap-stacked (lane-dense, host-known)
    ct = jnp.transpose(code_layer, (4, 1, 0, 2, 3)).astype(f32)    # (Wc, Cin, N, Dd, Hd)
    cpad = jnp.zeros((Wp2, Cin, N, Dp, Hp), f32)
    cpad = cpad.at[1 + Wd:1 + Wd + Wc, :, :, 1:1 + Dd, 1:1 + Hd].set(ct)
    cpad = cpad.reshape(Wp2, Cin, Lfull)
    codecols = jnp.concatenate(
        [cpad[:, :, kd * Hp + kh:kd * Hp + kh + Lc]
         for kd in range(K) for kh in range(K)], axis=1)           # (Wp2, 9*Cin, Lc)

    # ---- weights: tap/channel-stacked contractions, W-tap as leading index
    w_eq = jnp.flip(w_deconv, axis=(2, 3, 4))                      # transpose-conv -> fwd conv
    w1stk = jnp.transpose(w_eq, (2, 3, 1, 4, 0)).reshape(K * K, Cin, K * Cin)
    w2stk = jnp.transpose(w_conv, (4, 0, 2, 3, 1)).reshape(K, Cout, K * K * Cin)
    w2d = jnp.transpose(w_conv, (4, 2, 3, 0, 1)).reshape(K, K * K, Cout, Cin)
    b1 = b_deconv.reshape(Cin, 1).astype(f32)
    b2 = b_conv.reshape(Cout, 1).astype(f32)

    # ---- static 0/1 mask of lanes that are real (n,d,h) output positions (trace-time const)
    lane = np.arange(Lc)
    valid = ((lane % Hp) < Hd) & (((lane // Hp) % Dp) < Dd)
    mask = jnp.asarray(valid.astype(np.float32)).reshape(1, Lc)

    kernel = functools.partial(_decode_fused_kernel, K=K, Hp=Hp, Lc=Lc,
                               Lfull=Lfull, Wm=Wm, Wp2=Wp2, cin=Cin)
    vmem = pl.BlockSpec(memory_space=pltpu.MemorySpace.VMEM)
    # Tiny problem: a single resident block.  For production sizes the lane axis
    # (n*d*h) would be tiled with a halo and a "parallel" grid axis (v7x: 64 MiB VMEM,
    # 2 TensorCores).
    out = pl.pallas_call(
        kernel,
        out_shape=jax.ShapeDtypeStruct((Wm, Cout, Lc), f32),
        in_specs=[vmem] * 8,
        out_specs=vmem,
        scratch_shapes=[pltpu.VMEM((Cin, Lfull), f32)],
    )(xstk, codecols, w1stk, w2stk, w2d, b1, b2, mask)

    # ---- unpack lanes -> (N, Cout, Dd, Hd, Wm)
    out = jnp.pad(out, ((0, 0), (0, 0), (0, Lfull - Lc)))
    out = out.reshape(Wm, Cout, N, Dp, Hp)[:, :, :, :Dd, :Hd]
    return jnp.transpose(out, (2, 1, 3, 4, 0))
    # TODO(synk): Dropout(p=0.5) is treated as identity (module in eval mode); training-mode
    # stochastic masking is not implemented.


# ------------------------------ pure-JAX reference --------------------------------

def decode_layer_reference(x, params):
    wd, bd = params["w_deconv"], params["b_deconv"]
    wc, bc = params["w_conv"], params["b_conv"]
    code = params["code_layer"]
    dn = ("NCDHW", "OIDHW", "NCDHW")
    w_eq = jnp.transpose(jnp.flip(wd, axis=(2, 3, 4)), (1, 0, 2, 3, 4))
    deconv = lax.conv_general_dilated(
        x, w_eq, window_strides=(1, 1, 1),
        padding=((2, 2), (1, 1), (1, 1)), lhs_dilation=(1, 2, 2),
        dimension_numbers=dn, precision=jax.lax.Precision.HIGHEST)
    deconv = jnp.maximum(deconv + bd[None, :, None, None, None], 0.0)
    merge = jnp.concatenate([deconv, code], axis=4)
    conv = lax.conv_general_dilated(
        merge, wc, window_strides=(1, 1, 1), padding=((1, 1), (1, 1), (1, 1)),
        dimension_numbers=dn, precision=jax.lax.Precision.HIGHEST)
    conv = jnp.maximum(conv + bc[None, :, None, None, None], 0.0)
    return deconv + conv


# ------------------------------------ main -----------------------------------------

if __name__ == "__main__":
    key = jax.random.PRNGKey(0)
    N, Cin, Cout, K = 2, 4, 4, 3
    Di, Hi, Wi = 3, 4, 1        # W=1 so the final broadcast-add is valid (same constraint as PyTorch)
    Dd, Hd, Wd = Di + 2, 2 * Hi - 1, 2 * Wi - 1
    Wc_code = 8

    k1, k2, k3, k4, k5, k6 = jax.random.split(key, 6)
    params = {
        "w_deconv": 0.1 * jax.random.normal(k1, (Cin, Cin, K, K, K), jnp.float32),
        "b_deconv": 0.1 * jax.random.normal(k2, (Cin,), jnp.float32),
        "w_conv":   0.1 * jax.random.normal(k3, (Cout, Cin, K, K, K), jnp.float32),
        "b_conv":   0.1 * jax.random.normal(k4, (Cout,), jnp.float32),
        "code_layer": jax.random.normal(k5, (N, Cin, Dd, Hd, Wc_code), jnp.float32),
    }
    x = jax.random.normal(k6, (N, Cin, Di, Hi, Wi), jnp.float32)

    out = jax.jit(decode_layer_forward)(x, params)
    out = jax.block_until_ready(out)

    ref = decode_layer_reference(x, params)
    assert out.shape == (N, Cout, Dd, Hd, Wd + Wc_code), out.shape
    np.testing.assert_allclose(np.asarray(out), np.asarray(ref), rtol=2e-2, atol=2e-2)
    print("KERNEL_OK")
</pallas_src>

<mosaic_0001>
module attributes {stable_mosaic.version = 11 : i64} {
  func.func @_decode_fused_kernel(%arg0: memref<12x126xf32, #tpu.memory_space<vmem>>, %arg1: memref<11x36x106xf32, #tpu.memory_space<vmem>>, %arg2: memref<9x4x12xf32, #tpu.memory_space<vmem>>, %arg3: memref<3x4x36xf32, #tpu.memory_space<vmem>>, %arg4: memref<3x9x4x4xf32, #tpu.memory_space<vmem>>, %arg5: memref<4x1xf32, #tpu.memory_space<vmem>>, %arg6: memref<4x1xf32, #tpu.memory_space<vmem>>, %arg7: memref<1x106xf32, #tpu.memory_space<vmem>>, %arg8: memref<9x4x106xf32, #tpu.memory_space<vmem>>, %arg9: memref<4x126xf32, #tpu.memory_space<vmem>>) attributes {dimension_semantics = [], scalar_prefetch = 0 : i64, scratch_operands = 1 : i64, tpu.core_type = #tpu.core_type<tc>} {
    %c0 = arith.constant 0 : index
    %c0_0 = arith.constant 0 : index
    %c0_1 = arith.constant 0 : index
    %0 = vector.load %arg2[%c0, %c0_0, %c0_1] : memref<9x4x12xf32, #tpu.memory_space<vmem>>, vector<1x4x12xf32>
    %1 = vector.shape_cast %0 : vector<1x4x12xf32> to vector<4x12xf32>
    %c0_2 = arith.constant 0 : index
    %c0_3 = arith.constant 0 : index
    %2 = vector.load %arg0[%c0_2, %c0_3] : memref<12x126xf32, #tpu.memory_space<vmem>>, vector<12x106xf32>
    %cst = arith.constant dense<0.000000e+00> : vector<4x106xf32>
    %3 = tpu.matmul %1, %2, %cst {dimension_numbers = #tpu.dot_dimension_numbers<[1], [0], [0], [1], [0, 0, 1, 1], [], []>} : vector<4x12xf32>, vector<12x106xf32>, vector<4x106xf32> -> vector<4x106xf32>
    %c1 = arith.constant 1 : index
    %c0_4 = arith.constant 0 : index
    %c0_5 = arith.constant 0 : index
    %4 = vector.load %arg2[%c1, %c0_4, %c0_5] : memref<9x4x12xf32, #tpu.memory_space<vmem>>, vector<1x4x12xf32>
    %5 = vector.shape_cast %4 : vector<1x4x12xf32> to vector<4x12xf32>
    %c0_6 = arith.constant 0 : index
    %c1_7 = arith.constant 1 : index
    %6 = vector.load %arg0[%c0_6, %c1_7] : memref<12x126xf32, #tpu.memory_space<vmem>>, vector<12x106xf32>
    %cst_8 = arith.constant dense<0.000000e+00> : vector<4x106xf32>
    %7 = tpu.matmul %5, %6, %cst_8 {dimension_numbers = #tpu.dot_dimension_numbers<[1], [0], [0], [1], [0, 0, 1, 1], [], []>} : vector<4x12xf32>, vector<12x106xf32>, vector<4x106xf32> -> vector<4x106xf32>
    %8 = arith.addf %3, %7 : vector<4x106xf32>
    %c2 = arith.constant 2 : index
    %c0_9 = arith.constant 0 : index
    %c0_10 = arith.constant 0 : index
    %9 = vector.load %arg2[%c2, %c0_9, %c0_10] : memref<9x4x12xf32, #tpu.memory_space<vmem>>, vector<1x4x12xf32>
    %10 = vector.shape_cast %9 : vector<1x4x12xf32> to vector<4x12xf32>
    %c0_11 = arith.constant 0 : index
    %c2_12 = arith.constant 2 : index
    %11 = vector.load %arg0[%c0_11, %c2_12] : memref<12x126xf32, #tpu.memory_space<vmem>>, vector<12x106xf32>
    %cst_13 = arith.constant dense<0.000000e+00> : vector<4x106xf32>
    %12 = tpu.matmul %10, %11, %cst_13 {dimension_numbers = #tpu.dot_dimension_numbers<[1], [0], [0], [1], [0, 0, 1, 1], [], []>} : vector<4x12xf32>, vector<12x106xf32>, vector<4x106xf32> -> vector<4x106xf32>
    %13 = arith.addf %8, %12 : vector<4x106xf32>
    %c3 = arith.constant 3 : index
    %c0_14 = arith.constant 0 : index
    %c0_15 = arith.constant 0 : index
    %14 = vector.load %arg2[%c3, %c0_14, %c0_15] : memref<9x4x12xf32, #tpu.memory_space<vmem>>, vector<1x4x12xf32>
    %15 = vector.shape_cast %14 : vector<1x4x12xf32> to vector<4x12xf32>
    %c0_16 = arith.constant 0 : index
    %c9 = arith.constant 9 : index
    %16 = vector.load %arg0[%c0_16, %c9] : memref<12x126xf32, #tpu.memory_space<vmem>>, vector<12x106xf32>
    %cst_17 = arith.constant dense<0.000000e+00> : vector<4x106xf32>
    %17 = tpu.matmul %15, %16, %cst_17 {dimension_numbers = #tpu.dot_dimension_numbers<[1], [0], [0], [1], [0, 0, 1, 1], [], []>} : vector<4x12xf32>, vector<12x106xf32>, vector<4x106xf32> -> vector<4x106xf32>
    %18 = arith.addf %13, %17 : vector<4x106xf32>
    %c4 = arith.constant 4 : index
    %c0_18 = arith.constant 0 : index
    %c0_19 = arith.constant 0 : index
    %19 = vector.load %arg2[%c4, %c0_18, %c0_19] : memref<9x4x12xf32, #tpu.memory_space<vmem>>, vector<1x4x12xf32>
    %20 = vector.shape_cast %19 : vector<1x4x12xf32> to vector<4x12xf32>
    %c0_20 = arith.constant 0 : index
    %c10 = arith.constant 10 : index
    %21 = vector.load %arg0[%c0_20, %c10] : memref<12x126xf32, #tpu.memory_space<vmem>>, vector<12x106xf32>
    %cst_21 = arith.constant dense<0.000000e+00> : vector<4x106xf32>
    %22 = tpu.matmul %20, %21, %cst_21 {dimension_numbers = #tpu.dot_dimension_numbers<[1], [0], [0], [1], [0, 0, 1, 1], [], []>} : vector<4x12xf32>, vector<12x106xf32>, vector<4x106xf32> -> vector<4x106xf32>
    %23 = arith.addf %18, %22 : vector<4x106xf32>
    %c5 = arith.constant 5 : index
    %c0_22 = arith.constant 0 : index
    %c0_23 = arith.constant 0 : index
    %24 = vector.load %arg2[%c5, %c0_22, %c0_23] : memref<9x4x12xf32, #tpu.memory_space<vmem>>, vector<1x4x12xf32>
    %25 = vector.shape_cast %24 : vector<1x4x12xf32> to vector<4x12xf32>
    %c0_24 = arith.constant 0 : index
    %c11 = arith.constant 11 : index
    %26 = vector.load %arg0[%c0_24, %c11] : memref<12x126xf32, #tpu.memory_space<vmem>>, vector<12x106xf32>
    %cst_25 = arith.constant dense<0.000000e+00> : vector<4x106xf32>
    %27 = tpu.matmul %25, %26, %cst_25 {dimension_numbers = #tpu.dot_dimension_numbers<[1], [0], [0], [1], [0, 0, 1, 1], [], []>} : vector<4x12xf32>, vector<12x106xf32>, vector<4x106xf32> -> vector<4x106xf32>
    %28 = arith.addf %23, %27 : vector<4x106xf32>
    %c6 = arith.constant 6 : index
    %c0_26 = arith.constant 0 : index
    %c0_27 = arith.constant 0 : index
    %29 = vector.load %arg2[%c6, %c0_26, %c0_27] : memref<9x4x12xf32, #tpu.memory_space<vmem>>, vector<1x4x12xf32>
    %30 = vector.shape_cast %29 : vector<1x4x12xf32> to vector<4x12xf32>
    %c0_28 = arith.constant 0 : index
    %c18 = arith.constant 18 : index
    %31 = vector.load %arg0[%c0_28, %c18] : memref<12x126xf32, #tpu.memory_space<vmem>>, vector<12x106xf32>
    %cst_29 = arith.constant dense<0.000000e+00> : vector<4x106xf32>
    %32 = tpu.matmul %30, %31, %cst_29 {dimension_numbers = #tpu.dot_dimension_numbers<[1], [0], [0], [1], [0, 0, 1, 1], [], []>} : vector<4x12xf32>, vector<12x106xf32>, vector<4x106xf32> -> vector<4x106xf32>
    %33 = arith.addf %28, %32 : vector<4x106xf32>
    %c7 = arith.constant 7 : index
    %c0_30 = arith.constant 0 : index
    %c0_31 = arith.constant 0 : index
    %34 = vector.load %arg2[%c7, %c0_30, %c0_31] : memref<9x4x12xf32, #tpu.memory_space<vmem>>, vector<1x4x12xf32>
    %35 = vector.shape_cast %34 : vector<1x4x12xf32> to vector<4x12xf32>
    %c0_32 = arith.constant 0 : index
    %c19 = arith.constant 19 : index
    %36 = vector.load %arg0[%c0_32, %c19] : memref<12x126xf32, #tpu.memory_space<vmem>>, vector<12x106xf32>
    %cst_33 = arith.constant dense<0.000000e+00> : vector<4x106xf32>
    %37 = tpu.matmul %35, %36, %cst_33 {dimension_numbers = #tpu.dot_dimension_numbers<[1], [0], [0], [1], [0, 0, 1, 1], [], []>} : vector<4x12xf32>, vector<12x106xf32>, vector<4x106xf32> -> vector<4x106xf32>
    %38 = arith.addf %33, %37 : vector<4x106xf32>
    %c8 = arith.constant 8 : index
    %c0_34 = arith.constant 0 : index
    %c0_35 = arith.constant 0 : index
    %39 = vector.load %arg2[%c8, %c0_34, %c0_35] : memref<9x4x12xf32, #tpu.memory_space<vmem>>, vector<1x4x12xf32>
    %40 = vector.shape_cast %39 : vector<1x4x12xf32> to vector<4x12xf32>
    %c0_36 = arith.constant 0 : index
    %c20 = arith.constant 20 : index
    %41 = vector.load %arg0[%c0_36, %c20] : memref<12x126xf32, #tpu.memory_space<vmem>>, vector<12x106xf32>
    %cst_37 = arith.constant dense<0.000000e+00> : vector<4x106xf32>
    %42 = tpu.matmul %40, %41, %cst_37 {dimension_numbers = #tpu.dot_dimension_numbers<[1], [0], [0], [1], [0, 0, 1, 1], [], []>} : vector<4x12xf32>, vector<12x106xf32>, vector<4x106xf32> -> vector<4x106xf32>
    %43 = arith.addf %38, %42 : vector<4x106xf32>
    %c0_38 = arith.constant 0 : index
    %c0_39 = arith.constant 0 : index
    %44 = vector.load %arg5[%c0_38, %c0_39] : memref<4x1xf32, #tpu.memory_space<vmem>>, vector<4x1xf32>
    %45 = vector.broadcast %44 : vector<4x1xf32> to vector<4x106xf32>
    %46 = arith.addf %43, %45 : vector<4x106xf32>
    %cst_40 = arith.constant 0.000000e+00 : f32
    %47 = vector.broadcast %cst_40 : f32 to vector<4x106xf32>
    %48 = arith.maximumf %46, %47 : vector<4x106xf32>
    %c0_41 = arith.constant 0 : index
    %c0_42 = arith.constant 0 : index
    %49 = vector.load %arg7[%c0_41, %c0_42] : memref<1x106xf32, #tpu.memory_space<vmem>>, vector<1x106xf32>
    %50 = vector.broadcast %49 : vector<1x106xf32> to vector<4x106xf32>
    %51 = arith.mulf %48, %50 : vector<4x106xf32>
    %cst_43 = arith.constant 0.000000e+00 : f32
    %52 = vector.broadcast %cst_43 : f32 to vector<4x126xf32>
    %c0_44 = arith.constant 0 : index
    %c0_45 = arith.constant 0 : index
    %53 = vector.load %arg9[%c0_44, %c0_45] : memref<4x126xf32, #tpu.memory_space<vmem>>, vector<4x126xf32>
    tpu.vector_store %arg9[%c0_44, %c0_45], %52 {strides = array<i32>} : memref<4x126xf32, #tpu.memory_space<vmem>>, vector<4x126xf32>,
    %c0_46 = arith.constant 0 : index
    %c10_47 = arith.constant 10 : index
    %54 = vector.load %arg9[%c0_46, %c10_47] : memref<4x126xf32, #tpu.memory_space<vmem>>, vector<4x106xf32>
    tpu.vector_store %arg9[%c0_46, %c10_47], %51 {strides = array<i32>} : memref<4x126xf32, #tpu.memory_space<vmem>>, vector<4x106xf32>,
    %c0_48 = arith.constant 0 : index
    %c0_49 = arith.constant 0 : index
    %55 = vector.load %arg9[%c0_48, %c0_49] : memref<4x126xf32, #tpu.memory_space<vmem>>, vector<4x106xf32>
    %c0_50 = arith.constant 0 : index
    %c1_51 = arith.constant 1 : index
    %56 = vector.load %arg9[%c0_50, %c1_51] : memref<4x126xf32, #tpu.memory_space<vmem>>, vector<4x106xf32>
    %c0_52 = arith.constant 0 : index
    %c2_53 = arith.constant 2 : index
    %57 = vector.load %arg9[%c0_52, %c2_53] : memref<4x126xf32, #tpu.memory_space<vmem>>, vector<4x106xf32>
    %c0_54 = arith.constant 0 : index
    %c9_55 = arith.constant 9 : index
    %58 = vector.load %arg9[%c0_54, %c9_55] : memref<4x126xf32, #tpu.memory_space<vmem>>, vector<4x106xf32>
    %c0_56 = arith.constant 0 : index
    %c10_57 = arith.constant 10 : index
    %59 = vector.load %arg9[%c0_56, %c10_57] : memref<4x126xf32, #tpu.memory_space<vmem>>, vector<4x106xf32>
    %c0_58 = arith.constant 0 : index
    %c11_59 = arith.constant 11 : index
    %60 = vector.load %arg9[%c0_58, %c11_59] : memref<4x126xf32, #tpu.memory_space<vmem>>, vector<4x106xf32>
    %c0_60 = arith.constant 0 : index
    %c18_61 = arith.constant 18 : index
    %61 = vector.load %arg9[%c0_60, %c18_61] : memref<4x126xf32, #tpu.memory_space<vmem>>, vector<4x106xf32>
    %c0_62 = arith.constant 0 : index
    %c19_63 = arith.constant 19 : index
    %62 = vector.load %arg9[%c0_62, %c19_63] : memref<4x126xf32, #tpu.memory_space<vmem>>, vector<4x106xf32>
    %c0_64 = arith.constant 0 : index
    %c20_65 = arith.constant 20 : index
    %63 = vector.load %arg9[%c0_64, %c20_65] : memref<4x126xf32, #tpu.memory_space<vmem>>, vector<4x106xf32>
    %c0_66 = arith.constant 0 : index
    %c0_67 = arith.constant 0 : index
    %c0_68 = arith.constant 0 : index
    %64 = vector.load %arg3[%c0_66, %c0_67, %c0_68] : memref<3x4x36xf32, #tpu.memory_space<vmem>>, vector<1x4x36xf32>
    %65 = vector.shape_cast %64 : vector<1x4x36xf32> to vector<4x36xf32>
    %c1_69 = arith.constant 1 : index
    %c0_70 = arith.constant 0 : index
    %c0_71 = arith.constant 0 : index
    %66 = vector.load %arg3[%c1_69, %c0_70, %c0_71] : memref<3x4x36xf32, #tpu.memory_space<vmem>>, vector<1x4x36xf32>
    %67 = vector.shape_cast %66 : vector<1x4x36xf32> to vector<4x36xf32>
    %c2_72 = arith.constant 2 : index
    %c0_73 = arith.constant 0 : index
    %c0_74 = arith.constant 0 : index
    %68 = vector.load %arg3[%c2_72, %c0_73, %c0_74] : memref<3x4x36xf32, #tpu.memory_space<vmem>>, vector<1x4x36xf32>
    %69 = vector.shape_cast %68 : vector<1x4x36xf32> to vector<4x36xf32>
    %c0_75 = arith.constant 0 : index
    %c0_76 = arith.constant 0 : index
    %c0_77 = arith.constant 0 : index
    %70 = vector.load %arg1[%c0_75, %c0_76, %c0_77] : memref<11x36x106xf32, #tpu.memory_space<vmem>>, vector<1x36x106xf32>
    %71 = vector.shape_cast %70 : vector<1x36x106xf32> to vector<36x106xf32>
    %cst_78 = arith.constant dense<0.000000e+00> : vector<4x106xf32>
    %72 = tpu.matmul %65, %71, %cst_78 {dimension_numbers = #tpu.dot_dimension_numbers<[1], [0], [0], [1], [0, 0, 1, 1], [], []>} : vector<4x36xf32>, vector<36x106xf32>, vector<4x106xf32> -> vector<4x106xf32>
    %c0_79 = arith.constant 0 : index
    %c0_80 = arith.constant 0 : index
    %c0_81 = arith.constant 0 : index
    %c0_82 = arith.constant 0 : index
    %73 = vector.load %arg4[%c0_79, %c0_80, %c0_81, %c0_82] : memref<3x9x4x4xf32, #tpu.memory_space<vmem>>, vector<1x1x4x4xf32>
    %74 = vector.shape_cast %73 : vector<1x1x4x4xf32> to vector<4x4xf32>
    %cst_83 = arith.constant dense<0.000000e+00> : vector<4x106xf32>
    %75 = tpu.matmul %74, %55, %cst_83 {dimension_numbers = #tpu.dot_dimension_numbers<[1], [0], [0], [1], [0, 0, 1, 1], [], []>} : vector<4x4xf32>, vector<4x106xf32>, vector<4x106xf32> -> vector<4x106xf32>
    %c0_84 = arith.constant 0 : index
    %c1_85 = arith.constant 1 : index
    %c0_86 = arith.constant 0 : index
    %c0_87 = arith.constant 0 : index
    %76 = vector.load %arg4[%c0_84, %c1_85, %c0_86, %c0_87] : memref<3x9x4x4xf32, #tpu.memory_space<vmem>>, vector<1x1x4x4xf32>
    %77 = vector.shape_cast %76 : vector<1x1x4x4xf32> to vector<4x4xf32>
    %cst_88 = arith.constant dense<0.000000e+00> : vector<4x106xf32>
    %78 = tpu.matmul %77, %56, %cst_88 {dimension_numbers = #tpu.dot_dimension_numbers<[1], [0], [0], [1], [0, 0, 1, 1], [], []>} : vector<4x4xf32>, vector<4x106xf32>, vector<4x106xf32> -> vector<4x106xf32>
    %79 = arith.addf %75, %78 : vector<4x106xf32>
    %c0_89 = arith.constant 0 : index
    %c2_90 = arith.constant 2 : index
    %c0_91 = arith.constant 0 : index
    %c0_92 = arith.constant 0 : index
    %80 = vector.load %arg4[%c0_89, %c2_90, %c0_91, %c0_92] : memref<3x9x4x4xf32, #tpu.memory_space<vmem>>, vector<1x1x4x4xf32>
    %81 = vector.shape_cast %80 : vector<1x1x4x4xf32> to vector<4x4xf32>
    %cst_93 = arith.constant dense<0.000000e+00> : vector<4x106xf32>
    %82 = tpu.matmul %81, %57, %cst_93 {dimension_numbers = #tpu.dot_dimension_numbers<[1], [0], [0], [1], [0, 0, 1, 1], [], []>} : vector<4x4xf32>, vector<4x106xf32>, vector<4x106xf32> -> vector<4x106xf32>
    %83 = arith.addf %79, %82 : vector<4x106xf32>
    %c0_94 = arith.constant 0 : index
    %c3_95 = arith.constant 3 : index
    %c0_96 = arith.constant 0 : index
    %c0_97 = arith.constant 0 : index
    %84 = vector.load %arg4[%c0_94, %c3_95, %c0_96, %c0_97] : memref<3x9x4x4xf32, #tpu.memory_space<vmem>>, vector<1x1x4x4xf32>
    %85 = vector.shape_cast %84 : vector<1x1x4x4xf32> to vector<4x4xf32>
    %cst_98 = arith.constant dense<0.000000e+00> : vector<4x106xf32>
    %86 = tpu.matmul %85, %58, %cst_98 {dimension_numbers = #tpu.dot_dimension_numbers<[1], [0], [0], [1], [0, 0, 1, 1], [], []>} : vector<4x4xf32>, vector<4x106xf32>, vector<4x106xf32> -> vector<4x106xf32>
    %87 = arith.addf %83, %86 : vector<4x106xf32>
    %c0_99 = arith.constant 0 : index
    %c4_100 = arith.constant 4 : index
    %c0_101 = arith.constant 0 : index
    %c0_102 = arith.constant 0 : index
    %88 = vector.load %arg4[%c0_99, %c4_100, %c0_101, %c0_102] : memref<3x9x4x4xf32, #tpu.memory_space<vmem>>, vector<1x1x4x4xf32>
    %89 = vector.shape_cast %88 : vector<1x1x4x4xf32> to vector<4x4xf32>
    %cst_103 = arith.constant dense<0.000000e+00> : vector<4x106xf32>
    %90 = tpu.matmul %89, %59, %cst_103 {dimension_numbers = #tpu.dot_dimension_numbers<[1], [0], [0], [1], [0, 0, 1, 1], [], []>} : vector<4x4xf32>, vector<4x106xf32>, vector<4x106xf32> -> vector<4x106xf32>
    %91 = arith.addf %87, %90 : vector<4x106xf32>
    %c0_104 = arith.constant 0 : index
    %c5_105 = arith.constant 5 : index
    %c0_106 = arith.constant 0 : index
    %c0_107 = arith.constant 0 : index
    %92 = vector.load %arg4[%c0_104, %c5_105, %c0_106, %c0_107] : memref<3x9x4x4xf32, #tpu.memory_space<vmem>>, vector<1x1x4x4xf32>
    %93 = vector.shape_cast %92 : vector<1x1x4x4xf32> to vector<4x4xf32>
    %cst_108 = arith.constant dense<0.000000e+00> : vector<4x106xf32>
    %94 = tpu.matmul %93, %60, %cst_108 {dimension_numbers = #tpu.dot_dimension_numbers<[1], [0], [0], [1], [0, 0, 1, 1], [], []>} : vector<4x4xf32>, vector<4x106xf32>, vector<4x106xf32> -> vector<4x106xf32>
    %95 = arith.addf %91, %94 : vector<4x106xf32>
    %c0_109 = arith.constant 0 : index
    %c6_110 = arith.constant 6 : index
    %c0_111 = arith.constant 0 : index
    %c0_112 = arith.constant 0 : index
    %96 = vector.load %arg4[%c0_109, %c6_110, %c0_111, %c0_112] : memref<3x9x4x4xf32, #tpu.memory_space<vmem>>, vector<1x1x4x4xf32>
    %97 = vector.shape_cast %96 : vector<1x1x4x4xf32> to vector<4x4xf32>
    %cst_113 = arith.constant dense<0.000000e+00> : vector<4x106xf32>
    %98 = tpu.matmul %97, %61, %cst_113 {dimension_numbers = #tpu.dot_dimension_numbers<[1], [0], [0], [1], [0, 0, 1, 1], [], []>} : vector<4x4xf32>, vector<4x106xf32>, vector<4x106xf32> -> vector<4x106xf32>
    %99 = arith.addf %95, %98 : vector<4x106xf32>
    %c0_114 = arith.constant 0 : index
    %c7_115 = arith.constant 7 : index
    %c0_116 = arith.constant 0 : index
    %c0_117 = arith.constant 0 : index
    %100 = vector.load %arg4[%c0_114, %c7_115, %c0_116, %c0_117] : memref<3x9x4x4xf32, #tpu.memory_space<vmem>>, vector<1x1x4x4xf32>
    %101 = vector.shape_cast %100 : vector<1x1x4x4xf32> to vector<4x4xf32>
    %cst_118 = arith.constant dense<0.000000e+00> : vector<4x106xf32>
    %102 = tpu.matmul %101, %62, %cst_118 {dimension_numbers = #tpu.dot_dimension_numbers<[1], [0], [0], [1], [0, 0, 1, 1], [], []>} : vector<4x4xf32>, vector<4x106xf32>, vector<4x106xf32> -> vector<4x106xf32>
    %103 = arith.addf %99, %102 : vector<4x106xf32>
    %c0_119 = arith.constant 0 : index
    %c8_120 = arith.constant 8 : index
    %c0_121 = arith.constant 0 : index
    %c0_122 = arith.constant 0 : index
    %104 = vector.load %arg4[%c0_119, %c8_120, %c0_121, %c0_122] : memref<3x9x4x4xf32, #tpu.memory_space<vmem>>, vector<1x1x4x4xf32>
    %105 = vector.shape_cast %104 : vector<1x1x4x4xf32> to vector<4x4xf32>
    %cst_123 = arith.constant dense<0.000000e+00> : vector<4x106xf32>
    %106 = tpu.matmul %105, %63, %cst_123 {dimension_numbers = #tpu.dot_dimension_numbers<[1], [0], [0], [1], [0, 0, 1, 1], [], []>} : vector<4x4xf32>, vector<4x106xf32>, vector<4x106xf32> -> vector<4x106xf32>
    %107 = arith.addf %103, %106 : vector<4x106xf32>
    %c1_124 = arith.constant 1 : index
    %c0_125 = arith.constant 0 : index
    %c0_126 = arith.constant 0 : index
    %c0_127 = arith.constant 0 : index
    %108 = vector.load %arg4[%c1_124, %c0_125, %c0_126, %c0_127] : memref<3x9x4x4xf32, #tpu.memory_space<vmem>>, vector<1x1x4x4xf32>
    %109 = vector.shape_cast %108 : vector<1x1x4x4xf32> to vector<4x4xf32>
    %cst_128 = arith.constant dense<0.000000e+00> : vector<4x106xf32>
    %110 = tpu.matmul %109, %55, %cst_128 {dimension_numbers = #tpu.dot_dimension_numbers<[1], [0], [0], [1], [0, 0, 1, 1], [], []>} : vector<4x4xf32>, vector<4x106xf32>, vector<4x106xf32> -> vector<4x106xf32>
    %c1_129 = arith.constant 1 : index
    %c1_130 = arith.constant 1 : index
    %c0_131 = arith.constant 0 : index
    %c0_132 = arith.constant 0 : index
    %111 = vector.load %arg4[%c1_129, %c1_130, %c0_131, %c0_132] : memref<3x9x4x4xf32, #tpu.memory_space<vmem>>, vector<1x1x4x4xf32>
    %112 = vector.shape_cast %111 : vector<1x1x4x4xf32> to vector<4x4xf32>
    %cst_133 = arith.constant dense<0.000000e+00> : vector<4x106xf32>
    %113 = tpu.matmul %112, %56, %cst_133 {dimension_numbers = #tpu.dot_dimension_numbers<[1], [0], [0], [1], [0, 0, 1, 1], [], []>} : vector<4x4xf32>, vector<4x106xf32>, vector<4x106xf32> -> vector<4x106xf32>
    %114 = arith.addf %110, %113 : vector<4x106xf32>
    %c1_134 = arith.constant 1 : index
    %c2_135 = arith.constant 2 : index
    %c0_136 = arith.constant 0 : index
    %c0_137 = arith.constant 0 : index
    %115 = vector.load %arg4[%c1_134, %c2_135, %c0_136, %c0_137] : memref<3x9x4x4xf32, #tpu.memory_space<vmem>>, vector<1x1x4x4xf32>
    %116 = vector.shape_cast %115 : vector<1x1x4x4xf32> to vector<4x4xf32>
    %cst_138 = arith.constant dense<0.000000e+00> : vector<4x106xf32>
    %117 = tpu.matmul %116, %57, %cst_138 {dimension_numbers = #tpu.dot_dimension_numbers<[1], [0], [0], [1], [0, 0, 1, 1], [], []>} : vector<4x4xf32>, vector<4x106xf32>, vector<4x106xf32> -> vector<4x106xf32>
    %118 = arith.addf %114, %117 : vector<4x106xf32>
    %c1_139 = arith.constant 1 : index
    %c3_140 = arith.constant 3 : index
    %c0_141 = arith.constant 0 : index
    %c0_142 = arith.constant 0 : index
    %119 = vector.load %arg4[%c1_139, %c3_140, %c0_141, %c0_142] : memref<3x9x4x4xf32, #tpu.memory_space<vmem>>, vector<1x1x4x4xf32>
    %120 = vector.shape_cast %119 : vector<1x1x4x4xf32> to vector<4x4xf32>
    %cst_143 = arith.constant dense<0.000000e+00> : vector<4x106xf32>
    %121 = tpu.matmul %120, %58, %cst_143 {dimension_numbers = #tpu.dot_dimension_numbers<[1], [0], [0], [1], [0, 0, 1, 1], [], []>} : vector<4x4xf32>, vector<4x106xf32>, vector<4x106xf32> -> vector<4x106xf32>
    %122 = arith.addf %118, %121 : vector<4x106xf32>
    %c1_144 = arith.constant 1 : index
    %c4_145 = arith.constant 4 : index
    %c0_146 = arith.constant 0 : index
    %c0_147 = arith.constant 0 : index
    %123 = vector.load %arg4[%c1_144, %c4_145, %c0_146, %c0_147] : memref<3x9x4x4xf32, #tpu.memory_space<vmem>>, vector<1x1x4x4xf32>
    %124 = vector.shape_cast %123 : vector<1x1x4x4xf32> to vector<4x4xf32>
    %cst_148 = arith.constant dense<0.000000e+00> : vector<4x106xf32>
    %125 = tpu.matmul %124, %59, %cst_148 {dimension_numbers = #tpu.dot_dimension_numbers<[1], [0], [0], [1], [0, 0, 1, 1], [], []>} : vector<4x4xf32>, vector<4x106xf32>, vector<4x106xf32> -> vector<4x106xf32>
    %126 = arith.addf %122, %125 : vector<4x106xf32>
    %c1_149 = arith.constant 1 : index
    %c5_150 = arith.constant 5 : index
    %c0_151 = arith.constant 0 : index
    %c0_152 = arith.constant 0 : index
    %127 = vector.load %arg4[%c1_149, %c5_150, %c0_151, %c0_152] : memref<3x9x4x4xf32, #tpu.memory_space<vmem>>, vector<1x1x4x4xf32>
    %128 = vector.shape_cast %127 : vector<1x1x4x4xf32> to vector<4x4xf32>
    %cst_153 = arith.constant dense<0.000000e+00> : vector<4x106xf32>
    %129 = tpu.matmul %128, %60, %cst_153 {dimension_numbers = #tpu.dot_dimension_numbers<[1], [0], [0], [1], [0, 0, 1, 1], [], []>} : vector<4x4xf32>, vector<4x106xf32>, vector<4x106xf32> -> vector<4x106xf32>
    %130 = arith.addf %126, %129 : vector<4x106xf32>
    %c1_154 = arith.constant 1 : index
    %c6_155 = arith.constant 6 : index
    %c0_156 = arith.constant 0 : index
    %c0_157 = arith.constant 0 : index
    %131 = vector.load %arg4[%c1_154, %c6_155, %c0_156, %c0_157] : memref<3x9x4x4xf32, #tpu.memory_space<vmem>>, vector<1x1x4x4xf32>
    %132 = vector.shape_cast %131 : vector<1x1x4x4xf32> to vector<4x4xf32>
    %cst_158 = arith.constant dense<0.000000e+00> : vector<4x106xf32>
    %133 = tpu.matmul %132, %61, %cst_158 {dimension_numbers = #tpu.dot_dimension_numbers<[1], [0], [0], [1], [0, 0, 1, 1], [], []>} : vector<4x4xf32>, vector<4x106xf32>, vector<4x106xf32> -> vector<4x106xf32>
    %134 = arith.addf %130, %133 : vector<4x106xf32>
    %c1_159 = arith.constant 1 : index
    %c7_160 = arith.constant 7 : index
    %c0_161 = arith.constant 0 : index
    %c0_162 = arith.constant 0 : index
    %135 = vector.load %arg4[%c1_159, %c7_160, %c0_161, %c0_162] : memref<3x9x4x4xf32, #tpu.memory_space<vmem>>, vector<1x1x4x4xf32>
    %136 = vector.shape_cast %135 : vector<1x1x4x4xf32> to vector<4x4xf32>
    %cst_163 = arith.constant dense<0.000000e+00> : vector<4x106xf32>
    %137 = tpu.matmul %136, %62, %cst_163 {dimension_numbers = #tpu.dot_dimension_numbers<[1], [0], [0], [1], [0, 0, 1, 1], [], []>} : vector<4x4xf32>, vector<4x106xf32>, vector<4x106xf32> -> vector<4x106xf32>
    %138 = arith.addf %134, %137 : vector<4x106xf32>
    %c1_164 = arith.constant 1 : index
    %c8_165 = arith.constant 8 : index
    %c0_166 = arith.constant 0 : index
    %c0_167 = arith.constant 0 : index
    %139 = vector.load %arg4[%c1_164, %c8_165, %c0_166, %c0_167] : memref<3x9x4x4xf32, #tpu.memory_space<vmem>>, vector<1x1x4x4xf32>
    %140 = vector.shape_cast %139 : vector<1x1x4x4xf32> to vector<4x4xf32>
    %cst_168 = arith.constant dense<0.000000e+00> : vector<4x106xf32>
    %141 = tpu.matmul %140, %63, %cst_168 {dimension_numbers = #tpu.dot_dimension_numbers<[1], [0], [0], [1], [0, 0, 1, 1], [], []>} : vector<4x4xf32>, vector<4x106xf32>, vector<4x106xf32> -> vector<4x106xf32>
    %142 = arith.addf %138, %141 : vector<4x106xf32>
    %143 = arith.addf %72, %142 : vector<4x106xf32>
    %c2_169 = arith.constant 2 : index
    %c0_170 = arith.constant 0 : index
    %c0_171 = arith.constant 0 : index
    %144 = vector.load %arg1[%c2_169, %c0_170, %c0_171] : memref<11x36x106xf32, #tpu.memory_space<vmem>>, vector<1x36x106xf32>
    %145 = vector.shape_cast %144 : vector<1x36x106xf32> to vector<36x106xf32>
    %cst_172 = arith.constant dense<0.000000e+00> : vector<4x106xf32>
    %146 = tpu.matmul %65, %145, %cst_172 {dimension_numbers = #tpu.dot_dimension_numbers<[1], [0], [0], [1], [0, 0, 1, 1], [], []>} : vector<4x36xf32>, vector<36x106xf32>, vector<4x106xf32> -> vector<4x106xf32>
    %cst_173 = arith.constant dense<0.000000e+00> : vector<4x106xf32>
    %147 = tpu.matmul %67, %145, %cst_173 {dimension_numbers = #tpu.dot_dimension_numbers<[1], [0], [0], [1], [0, 0, 1, 1], [], []>} : vector<4x36xf32>, vector<36x106xf32>, vector<4x106xf32> -> vector<4x106xf32>
    %148 = arith.addf %107, %147 : vector<4x106xf32>
    %cst_174 = arith.constant dense<0.000000e+00> : vector<4x106xf32>
    %149 = tpu.matmul %69, %145, %cst_174 {dimension_numbers = #tpu.dot_dimension_numbers<[1], [0], [0], [1], [0, 0, 1, 1], [], []>} : vector<4x36xf32>, vector<36x106xf32>, vector<4x106xf32> -> vector<4x106xf32>
    %150 = arith.addf %143, %149 : vector<4x106xf32>
    %c3_175 = arith.constant 3 : index
    %c0_176 = arith.constant 0 : index
    %c0_177 = arith.constant 0 : index
    %151 = vector.load %arg1[%c3_175, %c0_176, %c0_177] : memref<11x36x106xf32, #tpu.memory_space<vmem>>, vector<1x36x106xf32>
    %152 = vector.shape_cast %151 : vector<1x36x106xf32> to vector<36x106xf32>
    %cst_178 = arith.constant dense<0.000000e+00> : vector<4x106xf32>
    %153 = tpu.matmul %65, %152, %cst_178 {dimension_numbers = #tpu.dot_dimension_numbers<[1], [0], [0], [1], [0, 0, 1, 1], [], []>} : vector<4x36xf32>, vector<36x106xf32>, vector<4x106xf32> -> vector<4x106xf32>
    %cst_179 = arith.constant dense<0.000000e+00> : vector<4x106xf32>
    %154 = tpu.matmul %67, %152, %cst_179 {dimension_numbers = #tpu.dot_dimension_numbers<[1], [0], [0], [1], [0, 0, 1, 1], [], []>} : vector<4x36xf32>, vector<36x106xf32>, vector<4x106xf32> -> vector<4x106xf32>
    %155 = arith.addf %146, %154 : vector<4x106xf32>
    %cst_180 = arith.constant dense<0.000000e+00> : vector<4x106xf32>
    %156 = tpu.matmul %69, %152, %cst_180 {dimension_numbers = #tpu.dot_dimension_numbers<[1], [0], [0], [1], [0, 0, 1, 1], [], []>} : vector<4x36xf32>, vector<36x106xf32>, vector<4x106xf32> -> vector<4x106xf32>
    %157 = arith.addf %148, %156 : vector<4x106xf32>
    %c4_181 = arith.constant 4 : index
    %c0_182 = arith.constant 0 : index
    %c0_183 = arith.constant 0 : index
    %158 = vector.load %arg1[%c4_181, %c0_182, %c0_183] : memref<11x36x106xf32, #tpu.memory_space<vmem>>, vector<1x36x106xf32>
    %159 = vector.shape_cast %158 : vector<1x36x106xf32> to vector<36x106xf32>
    %cst_184 = arith.constant dense<0.000000e+00> : vector<4x106xf32>
    %160 = tpu.matmul %65, %159, %cst_184 {dimension_numbers = #tpu.dot_dimension_numbers<[1], [0], [0], [1], [0, 0, 1, 1], [], []>} : vector<4x36xf32>, vector<36x106xf32>, vector<4x106xf32> -> vector<4x106xf32>
    %cst_185 = arith.constant dense<0.000000e+00> : vector<4x106xf32>
    %161 = tpu.matmul %67, %159, %cst_185 {dimension_numbers = #tpu.dot_dimension_numbers<[1], [0], [0], [1], [0, 0, 1, 1], [], []>} : vector<4x36xf32>, vector<36x106xf32>, vector<4x106xf32> -> vector<4x106xf32>
    %162 = arith.addf %153, %161 : vector<4x106xf32>
    %cst_186 = arith.constant dense<0.000000e+00> : vector<4x106xf32>
    %163 = tpu.matmul %69, %159, %cst_186 {dimension_numbers = #tpu.dot_dimension_numbers<[1], [0], [0], [1], [0, 0, 1, 1], [], []>} : vector<4x36xf32>, vector<36x106xf32>, vector<4x106xf32> -> vector<4x106xf32>
    %164 = arith.addf %155, %163 : vector<4x106xf32>
    %c5_187 = arith.constant 5 : index
    %c0_188 = arith.constant 0 : index
    %c0_189 = arith.constant 0 : index
    %165 = vector.load %arg1[%c5_187, %c0_188, %c0_189] : memref<11x36x106xf32, #tpu.memory_space<vmem>>, vector<1x36x106xf32>
    %166 = vector.shape_cast %165 : vector<1x36x106xf32> to vector<36x106xf32>
    %cst_190 = arith.constant dense<0.000000e+00> : vector<4x106xf32>
    %167 = tpu.matmul %65, %166, %cst_190 {dimension_numbers = #tpu.dot_dimension_numbers<[1], [0], [0], [1], [0, 0, 1, 1], [], []>} : vector<4x36xf32>, vector<36x106xf32>, vector<4x106xf32> -> vector<4x106xf32>
    %cst_191 = arith.constant dense<0.000000e+00> : vector<4x106xf32>
    %168 = tpu.matmul %67, %166, %cst_191 {dimension_numbers = #tpu.dot_dimension_numbers<[1], [0], [0], [1], [0, 0, 1, 1], [], []>} : vector<4x36xf32>, vector<36x106xf32>, vector<4x106xf32> -> vector<4x106xf32>
    %169 = arith.addf %160, %168 : vector<4x106xf32>
    %cst_192 = arith.constant dense<0.000000e+00> : vector<4x106xf32>
    %170 = tpu.matmul %69, %166, %cst_192 {dimension_numbers = #tpu.dot_dimension_numbers<[1], [0], [0], [1], [0, 0, 1, 1], [], []>} : vector<4x36xf32>, vector<36x106xf32>, vector<4x106xf32> -> vector<4x106xf32>
    %171 = arith.addf %162, %170 : vector<4x106xf32>
    %c6_193 = arith.constant 6 : index
    %c0_194 = arith.constant 0 : index
    %c0_195 = arith.constant 0 : index
    %172 = vector.load %arg1[%c6_193, %c0_194, %c0_195] : memref<11x36x106xf32, #tpu.memory_space<vmem>>, vector<1x36x106xf32>
    %173 = vector.shape_cast %172 : vector<1x36x106xf32> to vector<36x106xf32>
    %cst_196 = arith.constant dense<0.000000e+00> : vector<4x106xf32>
    %174 = tpu.matmul %65, %173, %cst_196 {dimension_numbers = #tpu.dot_dimension_numbers<[1], [0], [0], [1], [0, 0, 1, 1], [], []>} : vector<4x36xf32>, vector<36x106xf32>, vector<4x106xf32> -> vector<4x106xf32>
    %cst_197 = arith.constant dense<0.000000e+00> : vector<4x106xf32>
    %175 = tpu.matmul %67, %173, %cst_197 {dimension_numbers = #tpu.dot_dimension_numbers<[1], [0], [0], [1], [0, 0, 1, 1], [], []>} : vector<4x36xf32>, vector<36x106xf32>, vector<4x106xf32> -> vector<4x106xf32>
    %176 = arith.addf %167, %175 : vector<4x106xf32>
    %cst_198 = arith.constant dense<0.000000e+00> : vector<4x106xf32>
    %177 = tpu.matmul %69, %173, %cst_198 {dimension_numbers = #tpu.dot_dimension_numbers<[1], [0], [0], [1], [0, 0, 1, 1], [], []>} : vector<4x36xf32>, vector<36x106xf32>, vector<4x106xf32> -> vector<4x106xf32>
    %178 = arith.addf %169, %177 : vector<4x106xf32>
    %c7_199 = arith.constant 7 : index
    %c0_200 = arith.constant 0 : index
    %c0_201 = arith.constant 0 : index
    %179 = vector.load %arg1[%c7_199, %c0_200, %c0_201] : memref<11x36x106xf32, #tpu.memory_space<vmem>>, vector<1x36x106xf32>
    %180 = vector.shape_cast %179 : vector<1x36x106xf32> to vector<36x106xf32>
    %cst_202 = arith.constant dense<0.000000e+00> : vector<4x106xf32>
    %181 = tpu.matmul %65, %180, %cst_202 {dimension_numbers = #tpu.dot_dimension_numbers<[1], [0], [0], [1], [0, 0, 1, 1], [], []>} : vector<4x36xf32>, vector<36x106xf32>, vector<4x106xf32> -> vector<4x106xf32>
    %cst_203 = arith.constant dense<0.000000e+00> : vector<4x106xf32>
    %182 = tpu.matmul %67, %180, %cst_203 {dimension_numbers = #tpu.dot_dimension_numbers<[1], [0], [0], [1], [0, 0, 1, 1], [], []>} : vector<4x36xf32>, vector<36x106xf32>, vector<4x106xf32> -> vector<4x106xf32>
    %183 = arith.addf %174, %182 : vector<4x106xf32>
    %cst_204 = arith.constant dense<0.000000e+00> : vector<4x106xf32>
    %184 = tpu.matmul %69, %180, %cst_204 {dimension_numbers = #tpu.dot_dimension_numbers<[1], [0], [0], [1], [0, 0, 1, 1], [], []>} : vector<4x36xf32>, vector<36x106xf32>, vector<4x106xf32> -> vector<4x106xf32>
    %185 = arith.addf %176, %184 : vector<4x106xf32>
    %c8_205 = arith.constant 8 : index
    %c0_206 = arith.constant 0 : index
    %c0_207 = arith.constant 0 : index
    %186 = vector.load %arg1[%c8_205, %c0_206, %c0_207] : memref<11x36x106xf32, #tpu.memory_space<vmem>>, vector<1x36x106xf32>
    %187 = vector.shape_cast %186 : vector<1x36x106xf32> to vector<36x106xf32>
    %cst_208 = arith.constant dense<0.000000e+00> : vector<4x106xf32>
    %188 = tpu.matmul %65, %187, %cst_208 {dimension_numbers = #tpu.dot_dimension_numbers<[1], [0], [0], [1], [0, 0, 1, 1], [], []>} : vector<4x36xf32>, vector<36x106xf32>, vector<4x106xf32> -> vector<4x106xf32>
    %cst_209 = arith.constant dense<0.000000e+00> : vector<4x106xf32>
    %189 = tpu.matmul %67, %187, %cst_209 {dimension_numbers = #tpu.dot_dimension_numbers<[1], [0], [0], [1], [0, 0, 1, 1], [], []>} : vector<4x36xf32>, vector<36x106xf32>, vector<4x106xf32> -> vector<4x106xf32>
    %190 = arith.addf %181, %189 : vector<4x106xf32>
    %cst_210 = arith.constant dense<0.000000e+00> : vector<4x106xf32>
    %191 = tpu.matmul %69, %187, %cst_210 {dimension_numbers = #tpu.dot_dimension_numbers<[1], [0], [0], [1], [0, 0, 1, 1], [], []>} : vector<4x36xf32>, vector<36x106xf32>, vector<4x106xf32> -> vector<4x106xf32>
    %192 = arith.addf %183, %191 : vector<4x106xf32>
    %c9_211 = arith.constant 9 : index
    %c0_212 = arith.constant 0 : index
    %c0_213 = arith.constant 0 : index
    %193 = vector.load %arg1[%c9_211, %c0_212, %c0_213] : memref<11x36x106xf32, #tpu.memory_space<vmem>>, vector<1x36x106xf32>
    %194 = vector.shape_cast %193 : vector<1x36x106xf32> to vector<36x106xf32>
    %cst_214 = arith.constant dense<0.000000e+00> : vector<4x106xf32>
    %195 = tpu.matmul %67, %194, %cst_214 {dimension_numbers = #tpu.dot_dimension_numbers<[1], [0], [0], [1], [0, 0, 1, 1], [], []>} : vector<4x36xf32>, vector<36x106xf32>, vector<4x106xf32> -> vector<4x106xf32>
    %196 = arith.addf %188, %195 : vector<4x106xf32>
    %cst_215 = arith.constant dense<0.000000e+00> : vector<4x106xf32>
    %197 = tpu.matmul %69, %194, %cst_215 {dimension_numbers = #tpu.dot_dimension_numbers<[1], [0], [0], [1], [0, 0, 1, 1], [], []>} : vector<4x36xf32>, vector<36x106xf32>, vector<4x106xf32> -> vector<4x106xf32>
    %198 = arith.addf %190, %197 : vector<4x106xf32>
    %c10_216 = arith.constant 10 : index
    %c0_217 = arith.constant 0 : index
    %c0_218 = arith.constant 0 : index
    %199 = vector.load %arg1[%c10_216, %c0_217, %c0_218] : memref<11x36x106xf32, #tpu.memory_space<vmem>>, vector<1x36x106xf32>
    %200 = vector.shape_cast %199 : vector<1x36x106xf32> to vector<36x106xf32>
    %cst_219 = arith.constant dense<0.000000e+00> : vector<4x106xf32>
    %201 = tpu.matmul %69, %200, %cst_219 {dimension_numbers = #tpu.dot_dimension_numbers<[1], [0], [0], [1], [0, 0, 1, 1], [], []>} : vector<4x36xf32>, vector<36x106xf32>, vector<4x106xf32> -> vector<4x106xf32>
    %202 = arith.addf %196, %201 : vector<4x106xf32>
    %c0_220 = arith.constant 0 : index
    %c0_221 = arith.constant 0 : index
    %203 = vector.load %arg6[%c0_220, %c0_221] : memref<4x1xf32, #tpu.memory_space<vmem>>, vector<4x1xf32>
    %204 = vector.broadcast %203 : vector<4x1xf32> to vector<4x106xf32>
    %205 = arith.addf %150, %204 : vector<4x106xf32>
    %cst_222 = arith.constant 0.000000e+00 : f32
    %206 = vector.broadcast %cst_222 : f32 to vector<4x106xf32>
    %207 = arith.maximumf %205, %206 : vector<4x106xf32>
    %208 = arith.addf %207, %51 : vector<4x106xf32>
    %c0_223 = arith.constant 0 : index
    %c0_224 = arith.constant 0 : index
    %c0_225 = arith.constant 0 : index
    %209 = vector.load %arg8[%c0_223, %c0_224, %c0_225] : memref<9x4x106xf32, #tpu.memory_space<vmem>>, vector<1x4x106xf32>
    %210 = vector.shape_cast %209 : vector<1x4x106xf32> to vector<4x106xf32>
    %211 = vector.shape_cast %208 : vector<4x106xf32> to vector<1x4x106xf32>
    tpu.vector_store %arg8[%c0_223, %c0_224, %c0_225], %211 {strides = array<i32>} : memref<9x4x106xf32, #tpu.memory_space<vmem>>, vector<1x4x106xf32>,
    %c0_226 = arith.constant 0 : index
    %c0_227 = arith.constant 0 : index
    %212 = vector.load %arg6[%c0_226, %c0_227] : memref<4x1xf32, #tpu.memory_space<vmem>>, vector<4x1xf32>
    %213 = vector.broadcast %212 : vector<4x1xf32> to vector<4x106xf32>
    %214 = arith.addf %157, %213 : vector<4x106xf32>
    %cst_228 = arith.constant 0.000000e+00 : f32
    %215 = vector.broadcast %cst_228 : f32 to vector<4x106xf32>
    %216 = arith.maximumf %214, %215 : vector<4x106xf32>
    %217 = arith.addf %216, %51 : vector<4x106xf32>
    %c1_229 = arith.constant 1 : index
    %c0_230 = arith.constant 0 : index
    %c0_231 = arith.constant 0 : index
    %218 = vector.load %arg8[%c1_229, %c0_230, %c0_231] : memref<9x4x106xf32, #tpu.memory_space<vmem>>, vector<1x4x106xf32>
    %219 = vector.shape_cast %218 : vector<1x4x106xf32> to vector<4x106xf32>
    %220 = vector.shape_cast %217 : vector<4x106xf32> to vector<1x4x106xf32>
    tpu.vector_store %arg8[%c1_229, %c0_230, %c0_231], %220 {strides = array<i32>} : memref<9x4x106xf32, #tpu.memory_space<vmem>>, vector<1x4x106xf32>,
    %c0_232 = arith.constant 0 : index
    %c0_233 = arith.constant 0 : index
    %221 = vector.load %arg6[%c0_232, %c0_233] : memref<4x1xf32, #tpu.memory_space<vmem>>, vector<4x1xf32>
    %222 = vector.broadcast %221 : vector<4x1xf32> to vector<4x106xf32>
    %223 = arith.addf %164, %222 : vector<4x106xf32>
    %cst_234 = arith.constant 0.000000e+00 : f32
    %224 = vector.broadcast %cst_234 : f32 to vector<4x106xf32>
    %225 = arith.maximumf %223, %224 : vector<4x106xf32>
    %226 = arith.addf %225, %51 : vector<4x106xf32>
    %c2_235 = arith.constant 2 : index
    %c0_236 = arith.constant 0 : index
    %c0_237 = arith.constant 0 : index
    %227 = vector.load %arg8[%c2_235, %c0_236, %c0_237] : memref<9x4x106xf32, #tpu.memory_space<vmem>>, vector<1x4x106xf32>
    %228 = vector.shape_cast %227 : vector<1x4x106xf32> to vector<4x106xf32>
    %229 = vector.shape_cast %226 : vector<4x106xf32> to vector<1x4x106xf32>
    tpu.vector_store %arg8[%c2_235, %c0_236, %c0_237], %229 {strides = array<i32>} : memref<9x4x106xf32, #tpu.memory_space<vmem>>, vector<1x4x106xf32>,
    %c0_238 = arith.constant 0 : index
    %c0_239 = arith.constant 0 : index
    %230 = vector.load %arg6[%c0_238, %c0_239] : memref<4x1xf32, #tpu.memory_space<vmem>>, vector<4x1xf32>
    %231 = vector.broadcast %230 : vector<4x1xf32> to vector<4x106xf32>
    %232 = arith.addf %171, %231 : vector<4x106xf32>
    %cst_240 = arith.constant 0.000000e+00 : f32
    %233 = vector.broadcast %cst_240 : f32 to vector<4x106xf32>
    %234 = arith.maximumf %232, %233 : vector<4x106xf32>
    %235 = arith.addf %234, %51 : vector<4x106xf32>
    %c3_241 = arith.constant 3 : index
    %c0_242 = arith.constant 0 : index
    %c0_243 = arith.constant 0 : index
    %236 = vector.load %arg8[%c3_241, %c0_242, %c0_243] : memref<9x4x106xf32, #tpu.memory_space<vmem>>, vector<1x4x106xf32>
    %237 = vector.shape_cast %236 : vector<1x4x106xf32> to vector<4x106xf32>
    %238 = vector.shape_cast %235 : vector<4x106xf32> to vector<1x4x106xf32>
    tpu.vector_store %arg8[%c3_241, %c0_242, %c0_243], %238 {strides = array<i32>} : memref<9x4x106xf32, #tpu.memory_space<vmem>>, vector<1x4x106xf32>,
    %c0_244 = arith.constant 0 : index
    %c0_245 = arith.constant 0 : index
    %239 = vector.load %arg6[%c0_244, %c0_245] : memref<4x1xf32, #tpu.memory_space<vmem>>, vector<4x1xf32>
    %240 = vector.broadcast %239 : vector<4x1xf32> to vector<4x106xf32>
    %241 = arith.addf %178, %240 : vector<4x106xf32>
    %cst_246 = arith.constant 0.000000e+00 : f32
    %242 = vector.broadcast %cst_246 : f32 to vector<4x106xf32>
    %243 = arith.maximumf %241, %242 : vector<4x106xf32>
    %244 = arith.addf %243, %51 : vector<4x106xf32>
    %c4_247 = arith.constant 4 : index
    %c0_248 = arith.constant 0 : index
    %c0_249 = arith.constant 0 : index
    %245 = vector.load %arg8[%c4_247, %c0_248, %c0_249] : memref<9x4x106xf32, #tpu.memory_space<vmem>>, vector<1x4x106xf32>
    %246 = vector.shape_cast %245 : vector<1x4x106xf32> to vector<4x106xf32>
    %247 = vector.shape_cast %244 : vector<4x106xf32> to vector<1x4x106xf32>
    tpu.vector_store %arg8[%c4_247, %c0_248, %c0_249], %247 {strides = array<i32>} : memref<9x4x106xf32, #tpu.memory_space<vmem>>, vector<1x4x106xf32>,
    %c0_250 = arith.constant 0 : index
    %c0_251 = arith.constant 0 : index
    %248 = vector.load %arg6[%c0_250, %c0_251] : memref<4x1xf32, #tpu.memory_space<vmem>>, vector<4x1xf32>
    %249 = vector.broadcast %248 : vector<4x1xf32> to vector<4x106xf32>
    %250 = arith.addf %185, %249 : vector<4x106xf32>
    %cst_252 = arith.constant 0.000000e+00 : f32
    %251 = vector.broadcast %cst_252 : f32 to vector<4x106xf32>
    %252 = arith.maximumf %250, %251 : vector<4x106xf32>
    %253 = arith.addf %252, %51 : vector<4x106xf32>
    %c5_253 = arith.constant 5 : index
    %c0_254 = arith.constant 0 : index
    %c0_255 = arith.constant 0 : index
    %254 = vector.load %arg8[%c5_253, %c0_254, %c0_255] : memref<9x4x106xf32, #tpu.memory_space<vmem>>, vector<1x4x106xf32>
    %255 = vector.shape_cast %254 : vector<1x4x106xf32> to vector<4x106xf32>
    %256 = vector.shape_cast %253 : vector<4x106xf32> to vector<1x4x106xf32>
    tpu.vector_store %arg8[%c5_253, %c0_254, %c0_255], %256 {strides = array<i32>} : memref<9x4x106xf32, #tpu.memory_space<vmem>>, vector<1x4x106xf32>,
    %c0_256 = arith.constant 0 : index
    %c0_257 = arith.constant 0 : index
    %257 = vector.load %arg6[%c0_256, %c0_257] : memref<4x1xf32, #tpu.memory_space<vmem>>, vector<4x1xf32>
    %258 = vector.broadcast %257 : vector<4x1xf32> to vector<4x106xf32>
    %259 = arith.addf %192, %258 : vector<4x106xf32>
    %cst_258 = arith.constant 0.000000e+00 : f32
    %260 = vector.broadcast %cst_258 : f32 to vector<4x106xf32>
    %261 = arith.maximumf %259, %260 : vector<4x106xf32>
    %262 = arith.addf %261, %51 : vector<4x106xf32>
    %c6_259 = arith.constant 6 : index
    %c0_260 = arith.constant 0 : index
    %c0_261 = arith.constant 0 : index
    %263 = vector.load %arg8[%c6_259, %c0_260, %c0_261] : memref<9x4x106xf32, #tpu.memory_space<vmem>>, vector<1x4x106xf32>
    %264 = vector.shape_cast %263 : vector<1x4x106xf32> to vector<4x106xf32>
    %265 = vector.shape_cast %262 : vector<4x106xf32> to vector<1x4x106xf32>
    tpu.vector_store %arg8[%c6_259, %c0_260, %c0_261], %265 {strides = array<i32>} : memref<9x4x106xf32, #tpu.memory_space<vmem>>, vector<1x4x106xf32>,
    %c0_262 = arith.constant 0 : index
    %c0_263 = arith.constant 0 : index
    %266 = vector.load %arg6[%c0_262, %c0_263] : memref<4x1xf32, #tpu.memory_space<vmem>>, vector<4x1xf32>
    %267 = vector.broadcast %266 : vector<4x1xf32> to vector<4x106xf32>
    %268 = arith.addf %198, %267 : vector<4x106xf32>
    %cst_264 = arith.constant 0.000000e+00 : f32
    %269 = vector.broadcast %cst_264 : f32 to vector<4x106xf32>
    %270 = arith.maximumf %268, %269 : vector<4x106xf32>
    %271 = arith.addf %270, %51 : vector<4x106xf32>
    %c7_265 = arith.constant 7 : index
    %c0_266 = arith.constant 0 : index
    %c0_267 = arith.constant 0 : index
    %272 = vector.load %arg8[%c7_265, %c0_266, %c0_267] : memref<9x4x106xf32, #tpu.memory_space<vmem>>, vector<1x4x106xf32>
    %273 = vector.shape_cast %272 : vector<1x4x106xf32> to vector<4x106xf32>
    %274 = vector.shape_cast %271 : vector<4x106xf32> to vector<1x4x106xf32>
    tpu.vector_store %arg8[%c7_265, %c0_266, %c0_267], %274 {strides = array<i32>} : memref<9x4x106xf32, #tpu.memory_space<vmem>>, vector<1x4x106xf32>,
    %c0_268 = arith.constant 0 : index
    %c0_269 = arith.constant 0 : index
    %275 = vector.load %arg6[%c0_268, %c0_269] : memref<4x1xf32, #tpu.memory_space<vmem>>, vector<4x1xf32>
    %276 = vector.broadcast %275 : vector<4x1xf32> to vector<4x106xf32>
    %277 = arith.addf %202, %276 : vector<4x106xf32>
    %cst_270 = arith.constant 0.000000e+00 : f32
    %278 = vector.broadcast %cst_270 : f32 to vector<4x106xf32>
    %279 = arith.maximumf %277, %278 : vector<4x106xf32>
    %280 = arith.addf %279, %51 : vector<4x106xf32>
    %c8_271 = arith.constant 8 : index
    %c0_272 = arith.constant 0 : index
    %c0_273 = arith.constant 0 : index
    %281 = vector.load %arg8[%c8_271, %c0_272, %c0_273] : memref<9x4x106xf32, #tpu.memory_space<vmem>>, vector<1x4x106xf32>
    %282 = vector.shape_cast %281 : vector<1x4x106xf32> to vector<4x106xf32>
    %283 = vector.shape_cast %280 : vector<4x106xf32> to vector<1x4x106xf32>
    tpu.vector_store %arg8[%c8_271, %c0_272, %c0_273], %283 {strides = array<i32>} : memref<9x4x106xf32, #tpu.memory_space<vmem>>, vector<1x4x106xf32>,
    return
  }
}

</mosaic_0001>

<bundles_post_ra>
// kernel: decode_layer_forward.1
= control target key start
LH: loop header
LB: loop body
LE: loop exit
PB: predicated region body
PF: predicated region fallthrough
CT: control target
= control target key end

     0   :  { %v5055_v1 = vmov 0.0   ;;  %vm5056_vm0 = vmmov 0   ;;  %s5057_s29 = smov 127   ;;  %s5058_s30 = smov 126   ;;  %v5062_v3 = vmov 0   ;;  %vm45_vm1 = vcmask 1043456   ;;  %s5907_s0 = inlined_call_operand.vmem [shape: f32[12,126], index: 0, kind: input, shape index: {}]   ;;  %s5908_s5 = inlined_call_operand.vmem [shape: f32[4,1], index: 5, kind: input, shape index: {}]   ;;  %s5909_s2 = inlined_call_operand.vmem [shape: f32[9,4,12], index: 2, kind: input, shape index: {}]   ;;  %s5910_s7 = inlined_call_operand.vmem [shape: f32[1,106], index: 7, kind: input, shape index: {}]   ;;  %s5911_s4 = inlined_call_operand.vmem [shape: f32[3,9,4,4], index: 4, kind: input, shape index: {}]   ;;  %s5912_s6 = inlined_call_operand.vmem [shape: f32[4,1], index: 6, kind: input, shape index: {}]   ;;  %s5913_s1 = inlined_call_operand.vmem [shape: f32[11,36,106], index: 1, kind: input, shape index: {}]   ;;  %s5914_s3 = inlined_call_operand.vmem [shape: f32[3,4,36], index: 3, kind: input, shape index: {}]   ;;  %s5915_s8 = inlined_call_operand.vmem [shape: f32[9,4,106], index: 8, kind: output, shape index: {}]  }
   0x1   :  { %v31_v0 = vld [vmem:[%s5907_s0 + $0x8] sm:$0xf]  ;;  %4563 = vmatprep.subr.mxu0 %v5055_v1  ;;  %4567 = vmatprep.mubr.msk.f32.mxu0 %vm5056_vm0, %v5055_v1  ;;  %v30_v2 = vld [vmem:[%s5907_s0] sm:$0xff]  ;;  %s5059_s11 = smov 119   ;;  %s5060_s12 = smov 118   ;;  %vm41_vm2 = vcmask 97280  }
   0x2   :  { %38 = vrot.lane.b32.xlu0 %v31_v0, %s5057_s29  ;;  %197 = vrot.lane.b32.xlu1 %v31_v0, %s5058_s30  ;;  %s5061_s0 = smov 117   ;;  %s5063_s13 = smov 110   ;;  %v774_v4 = vld [vmem:[%s5908_s5] sm:$0xf]  ;;  %v4165_v7 = vld [vmem:[%s5909_s2 + $0x4] sm:$0xf] }
   0x3   :  { %4584 = vmatprep.subr.mxu1 %v5055_v1  ;;  %4588 = vmatprep.mubr.msk.f32.mxu1 %vm5056_vm0, %v5055_v1  ;;  %s5064_s14 = smov 109   ;;  %s5065_s15 = smov 108   ;;  %v29_v10 = vld [vmem:[%s5909_s2] sm:$0xf]  ;;  %v4170_v13 = vld [vmem:[%s5909_s2 + $0x8] sm:$0xf] }
   0x4   :  { %5053 = vset.pattern.permute.xlu0 %v5062_v3  ;;  %5054 = vset.pattern.permute.xlu1 %v5062_v3  ;;  %v4173_v16 = vld [vmem:[%s5909_s2 + $0xc] sm:$0xf]  ;;  %v4176_v17 = vld [vmem:[%s5909_s2 + $0x10] sm:$0xf]  ;;  %v4179_v20 = vld [vmem:[%s5909_s2 + $0x14] sm:$0xf] }
   0x5   :  { %v4182_v23 = vld [vmem:[%s5909_s2 + $0x18] sm:$0xf]  ;;  %v4185_v26 = vld [vmem:[%s5909_s2 + $0x1c] sm:$0xf]  ;;  %v4188_v29 = vld [vmem:[%s5909_s2 + $0x20] sm:$0xf] }
   0x6   :  { %36 = vrot.lane.b32.xlu0 %v30_v2, %s5057_s29  ;;  %195 = vrot.lane.b32.xlu1 %v30_v2, %s5058_s30  ;;  %vm790_vm3 = vcmask 1027072   ;;  %v4191_v58 = vld [vmem:[%s5910_s7] ss:$0 sm:$0xff]  ;;  %s5066_s20 = smov 10   ;;  %vm796_vm4 = vcmask 945232   ;;  %vm815_vm5 = vcmask 31744  }
   0x7   :  { %791 = vst.msk [vmem:[#allocation2] sm:$0xf] %vm790_vm3, %v5055_v1  ;;  %v809_v63 = vld [vmem:[%s5911_s4] sm:$0xf]  ;;  %vm2208_vm6 = vcmask 293888   ;;  %vm4071_vm7 = vcmask 863232  }
   0x8   :  { %v4117_v3 = vld [vmem:[%s5912_s6] sm:$0xf] }
   0xa   :  { %280 = vrot.lane.b32.xlu0 %v31_v0, %s5059_s11  ;;  %278 = vrot.lane.b32.xlu1 %v30_v2, %s5059_s11 }
   0xe   :  { %363 = vrot.lane.b32.xlu0 %v31_v0, %s5060_s12  ;;  %361 = vrot.lane.b32.xlu1 %v30_v2, %s5060_s12 }
  0x12   :  { %446 = vrot.lane.b32.xlu0 %v31_v0, %s5061_s0  ;;  %444 = vrot.lane.b32.xlu1 %v30_v2, %s5061_s0 }
  0x16   :  { %529 = vrot.lane.b32.xlu0 %v31_v0, %s5063_s13  ;;  %527 = vrot.lane.b32.xlu1 %v30_v2, %s5063_s13 }
  0x1a   :  { %612 = vrot.lane.b32.xlu0 %v31_v0, %s5064_s14  ;;  %610 = vrot.lane.b32.xlu1 %v30_v2, %s5064_s14 }
  0x1e   :  { %695 = vrot.lane.b32.xlu0 %v31_v0, %s5065_s15  ;;  %693 = vrot.lane.b32.xlu1 %v30_v2, %s5065_s15 }
  0x22   :  { %777 = vperm.xlu0 %5053, %v774_v4   ;;  %v4139_v4 = vld [vmem:[%s5912_s6] sm:$0xf] }
  0x74   :  { %v39_v5 = vpop.permute.xlu0 %38  ;;  %v198_v6 = vpop.permute.xlu1 %197 }
  0x75   :  { %4564 = vmatpush3.msk.msra.mxu0 %vm45_vm1, %v39_v5  ;;  %v4194_v5 = vld [vmem:[%s5911_s4 + $0x4] sm:$0xf] }
  0x76   :  { %4565 = vmatprep.subr.mxu0 %v5055_v1 }
  0x78   :  { %v37_v8 = vpop.permute.xlu0 %36  ;;  %v196_v9 = vpop.permute.xlu1 %195 }
  0x79   :  { %4566 = vmatpush3.msra.mxu0 %v37_v8  ;;  %v4199_v8 = vld [vmem:[%s5911_s4 + $0x8] sm:$0xf] }
  0x7a   :  { %4568 = vmatmul.mubr.msk.f32.vlgmr.msra.gmra.mxu0 %vm41_vm2, %v4165_v7  ;;  %4570 = vmatprep.subr.mxu0 %v5055_v1 }
  0x7b   :  { %4571 = vmatpush3.msk.msra.mxu0 %vm45_vm1, %v31_v0  ;;  %4574 = vmatprep.mubr.msk.f32.mxu0 %vm5056_vm0, %v5055_v1  ;;  %v4073_v0 = vld [vmem:[%s5912_s6] sm:$0xf] }
  0x7c   :  { %4572 = vmatprep.subr.mxu0 %v5055_v1  ;;  %v281_v11 = vpop.permute.xlu0 %280  ;;  %v279_v12 = vpop.permute.xlu1 %278 }
  0x7d   :  { %4573 = vmatpush3.msra.mxu0 %v30_v2  ;;  %4585 = vmatpush3.msk.msra.mxu1 %vm45_vm1, %v281_v11  ;;  %v4095_v2 = vld [vmem:[%s5912_s6] sm:$0xf]  ;;  %v4202_v11 = vld [vmem:[%s5911_s4 + $0xc] sm:$0xf] }
  0x7e   :  { %4575 = vmatmul.mubr.msk.f32.vlgmr.msra.gmra.mxu0 %vm41_vm2, %v29_v10  ;;  %4577 = vmatprep.subr.mxu0 %v5055_v1 }
  0x7f   :  { %4586 = vmatprep.subr.mxu1 %v5055_v1  ;;  %4578 = vmatpush3.msk.msra.mxu0 %vm45_vm1, %v198_v6 }
  0x80   :  { %4587 = vmatpush3.msra.mxu1 %v279_v12  ;;  %4579 = vmatprep.subr.mxu0 %v5055_v1  ;;  %v364_v14 = vpop.permute.xlu0 %363  ;;  %v362_v15 = vpop.permute.xlu1 %361  ;;  %v4205_v12 = vld [vmem:[%s5911_s4 + $0x10] sm:$0xf] }
  0x81   :  { %4580 = vmatpush3.msra.mxu0 %v196_v9  ;;  %4581 = vmatprep.mubr.msk.f32.mxu0 %vm5056_vm0, %v5055_v1 }
  0x82   :  { %4582 = vmatmul.mubr.msk.f32.vlgmr.msra.gmra.mxu0 %vm41_vm2, %v4170_v13  ;;  %4591 = vmatprep.subr.mxu0 %v5055_v1 }
  0x83   :  { %4592 = vmatpush3.msk.msra.mxu0 %vm45_vm1, %v364_v14  ;;  %4589 = vmatmul.mubr.msk.f32.vlgmr.msra.gmra.mxu1 %vm41_vm2, %v4173_v16  ;;  %v4211_v16 = vld [vmem:[%s5911_s4 + $0x18] sm:$0xf] }
  0x84   :  { %4593 = vmatprep.subr.mxu0 %v5055_v1  ;;  %4598 = vmatprep.subr.mxu1 %v5055_v1  ;;  %v447_v18 = vpop.permute.xlu0 %446  ;;  %v445_v19 = vpop.permute.xlu1 %444 }
  0x85   :  { %4594 = vmatpush3.msra.mxu0 %v362_v15  ;;  %4595 = vmatprep.mubr.msk.f32.mxu0 %vm5056_vm0, %v5055_v1  ;;  %v4208_v15 = vld [vmem:[%s5911_s4 + $0x14] sm:$0xf] }
  0x86   :  { %4599 = vmatpush3.msk.msra.mxu1 %vm45_vm1, %v447_v18  ;;  %4596 = vmatmul.mubr.msk.f32.vlgmr.msra.gmra.mxu0 %vm41_vm2, %v4176_v17 }
  0x87   :  { %4600 = vmatprep.subr.mxu1 %v5055_v1  ;;  %4602 = vmatprep.mubr.msk.f32.mxu1 %vm5056_vm0, %v5055_v1 }
  0x88   :  { %4601 = vmatpush3.msra.mxu1 %v445_v19  ;;  %4605 = vmatprep.subr.mxu0 %v5055_v1  ;;  %v530_v21 = vpop.permute.xlu0 %529  ;;  %v528_v22 = vpop.permute.xlu1 %527  ;;  %v4214_v19 = vld [vmem:[%s5911_s4 + $0x1c] sm:$0xf] }
  0x89   :  { %4603 = vmatmul.mubr.msk.f32.vlgmr.msra.gmra.mxu1 %vm41_vm2, %v4179_v20  ;;  %4606 = vmatpush3.msk.msra.mxu0 %vm45_vm1, %v530_v21  ;;  %v4217_v20 = vld [vmem:[%s5911_s4 + $0x20] sm:$0xf]  ;;  %v4221_v21 = vld [vmem:[%s5911_s4 + $0x28] sm:$0xf] }
  0x8a   :  { %4607 = vmatprep.subr.mxu0 %v5055_v1  ;;  %4609 = vmatprep.mubr.msk.f32.mxu0 %vm5056_vm0, %v5055_v1 }
  0x8b   :  { %4608 = vmatpush3.msra.mxu0 %v528_v22  ;;  %4612 = vmatprep.subr.mxu1 %v5055_v1  ;;  %v4220_v22 = vld [vmem:[%s5911_s4 + $0x24] sm:$0xf] }
  0x8c   :  { %4610 = vmatmul.mubr.msk.f32.vlgmr.msra.gmra.mxu0 %vm41_vm2, %v4182_v23  ;;  %v613_v24 = vpop.permute.xlu0 %612  ;;  %v611_v25 = vpop.permute.xlu1 %610  ;;  %4616 = vmatprep.mubr.msk.f32.mxu1 %vm5056_vm0, %v5055_v1  ;;  %v4226_v23 = vld [vmem:[%s5911_s4 + $0x2c] sm:$0xf] }
  0x8d   :  { %4613 = vmatpush3.msk.msra.mxu1 %vm45_vm1, %v613_v24  ;;  %4619 = vmatprep.subr.mxu0 %v5055_v1  ;;  %v4229_v24 = vld [vmem:[%s5911_s4 + $0x30] sm:$0xf] }
  0x8e   :  { %4614 = vmatprep.subr.mxu1 %v5055_v1  ;;  %4623 = vmatprep.mubr.msk.f32.mxu0 %vm5056_vm0, %v5055_v1 }
  0x8f   :  { %4615 = vmatpush3.msra.mxu1 %v611_v25  ;;  %v4232_v25 = vld [vmem:[%s5911_s4 + $0x34] sm:$0xf] }
  0x90   :  { %4617 = vmatmul.mubr.msk.f32.vlgmr.msra.gmra.mxu1 %vm41_vm2, %v4185_v26  ;;  %v696_v27 = vpop.permute.xlu0 %695  ;;  %v694_v28 = vpop.permute.xlu1 %693  ;;  %4626 = vmatprep.subr.mxu1 %v5055_v1  ;;  %v4235_v26 = vld [vmem:[%s5911_s4 + $0x38] sm:$0xf] }
  0x91   :  { %4620 = vmatpush3.msk.msra.mxu0 %vm45_vm1, %v696_v27  ;;  %4628 = vmatprep.mubr.msk.f32.mxu1 %vm5056_vm0, %v5055_v1  ;;  %v4238_v27 = vld [vmem:[%s5911_s4 + $0x3c] sm:$0xf] }
  0x92   :  { %4621 = vmatprep.subr.mxu0 %v5055_v1 }
  0x93   :  { %4622 = vmatpush3.msra.mxu0 %v694_v28  ;;  %v4241_v28 = vld [vmem:[%s5911_s4 + $0x40] sm:$0xf] }
  0x94   :  { %4624 = vmatmul.mubr.msk.f32.vlgmr.msra.gmra.mxu0 %vm41_vm2, %v4188_v29  ;;  %4631 = vmatprep.subr.mxu0 %v5055_v1  ;;  %v808_v29 = vld [vmem:[%s5913_s1 + $0x20] sm:$0xf] }
  0x95   :  { %4633 = vmatprep.mubr.msk.f32.mxu0 %vm5056_vm0, %v5055_v1 }
  0x9d   :  { %v778_v54 = vpop.permute.xlu0 %777 }
 0x13a   :  { %v114_v30 = vpop.f32.mrf.mxu0 }
 0x13c   :  { %v4569_v31 = vpop.f32.mrf.mxu0 }
 0x13d   :  { %v4244_v31 = vld [vmem:[%s5911_s4 + $0x44] sm:$0xf] }
 0x13e   :  { %v189_v32 = vpop.f32.mrf.mxu0 }
 0x13f   :  { %v190_v33 = vadd.f32 %v189_v32, %v114_v30  ;;  %v807_v30 = vld [vmem:[%s5913_s1 + $0x18] sm:$0xff]  ;;  %v4253_v32 = vld [vmem:[%s5913_s1 + $0x70] sm:$0xf] }
 0x140   :  { %v4576_v34 = vpop.f32.mrf.mxu0 }
 0x141   :  { %v4252_v34 = vld [vmem:[%s5913_s1 + $0x68] sm:$0xff] }
 0x142   :  { %v271_v35 = vpop.f32.mrf.mxu0 }
 0x143   :  { %v275_v36 = vadd.f32 %v271_v35, %v190_v33  ;;  %v354_v37 = vpop.f32.mrf.mxu1  ;;  %v806_v33 = vld [vmem:[%s5913_s1 + $0x10] sm:$0xff]  ;;  %v805_v35 = vld [vmem:[%s5913_s1 + $0x8] sm:$0xff] }
 0x144   :  { %v4583_v38 = vpop.f32.mrf.mxu0 }
 0x145   :  { %v4590_v39 = vpop.f32.mrf.mxu1  ;;  %v358_v41 = vadd.f32 %v354_v37, %v275_v36  ;;  %v804_v36 = vld [vmem:[%s5913_s1] sm:$0xff] }
 0x146   :  { %v437_v40 = vpop.f32.mrf.mxu0  ;;  %v4251_v37 = vld [vmem:[%s5913_s1 + $0x60] sm:$0xff]  ;;  %v4250_v39 = vld [vmem:[%s5913_s1 + $0x58] sm:$0xff] }
 0x147   :  { %v441_v44 = vadd.f32 %v437_v40, %v358_v41  ;;  %v5445_v38 = vld [vmem:[%s5914_s3] sm:$0xf]  ;;  %v4249_v40 = vld [vmem:[%s5913_s1 + $0x50] sm:$0xff]  ;;  %v5465_v41 = vld [vmem:[%s5914_s3 + $0x4] sm:$0xf] }
 0x148   :  { %v4597_v42 = vpop.f32.mrf.mxu0 }
 0x149   :  { %v520_v43 = vpop.f32.mrf.mxu1  ;;  %v4262_v42 = vld [vmem:[%s5913_s1 + $0x98] sm:$0xf] }
 0x14a   :  { %v524_v48 = vadd.f32 %v520_v43, %v441_v44  ;;  %v4261_v43 = vld [vmem:[%s5913_s1 + $0x90] sm:$0xff]  ;;  %v4260_v44 = vld [vmem:[%s5913_s1 + $0x88] sm:$0xff] }
 0x14b   :  { %v4604_v45 = vpop.f32.mrf.mxu1 }
 0x14c   :  { %v603_v46 = vpop.f32.mrf.mxu0  ;;  %v5490_v45 = vld [vmem:[%s5914_s3 + $0x8] sm:$0xf] }
 0x14d   :  { %v607_v50 = vadd.f32 %v603_v46, %v524_v48  ;;  %v4259_v46 = vld [vmem:[%s5913_s1 + $0x80] sm:$0xff] }
 0x14e   :  { %v4611_v47 = vpop.f32.mrf.mxu0  ;;  %v5524_v48 = vld [vmem:[%s5913_s1 + $0xc0] sm:$0xf] }
 0x14f   :  { %v4258_v47 = vld [vmem:[%s5913_s1 + $0x78] sm:$0xff] }
 0x150   :  { %v686_v49 = vpop.f32.mrf.mxu1 }
 0x151   :  { %v690_v52 = vadd.f32 %v686_v49, %v607_v50  ;;  %v4272_v49 = vld [vmem:[%s5913_s1 + $0xb8] sm:$0xff]  ;;  %v5540_v50 = vld [vmem:[%s5913_s1 + $0xb0] sm:$0xff] }
 0x152   :  { %v4618_v51 = vpop.f32.mrf.mxu1 }
 0x153   :  { %v4270_v51 = vld [vmem:[%s5913_s1 + $0xa8] sm:$0xff] }
 0x154   :  { %v769_v53 = vpop.f32.mrf.mxu0 }
 0x155   :  { %v773_v55 = vadd.f32 %v769_v53, %v690_v52  ;;  %v4269_v52 = vld [vmem:[%s5913_s1 + $0xa0] sm:$0xff] }
 0x156   :  { %v4625_v56 = vpop.f32.mrf.mxu0 }
 0x157   :  { %v780_v57 = vadd.f32 %v778_v54, %v773_v55  ;;  %v4284_v55 = vld [vmem:[%s5913_s1 + $0xe8] sm:$0xf]  ;;  %v4283_v56 = vld [vmem:[%s5913_s1 + $0xe0] sm:$0xff] }
 0x159   :  { %v781_v59 = vmax.f32 %v780_v57, 0.0  ;;  %v4282_v57 = vld [vmem:[%s5913_s1 + $0xd8] sm:$0xff] }
 0x15b   :  { %v5228_v60 = vmul.f32 %v4191_v58, %v781_v59  ;;  %v4281_v58 = vld [vmem:[%s5913_s1 + $0xd0] sm:$0xff]  ;;  %v4280_v59 = vld [vmem:[%s5913_s1 + $0xc8] sm:$0xff] }
 0x15d   :  { %793 = vrot.lane.b32.xlu1 %v5228_v60, %s5066_s20 }
 0x1cf   :  { %v794_v61 = vpop.permute.xlu1 %793 }
 0x1d0   :  { %797 = vst.msk [vmem:[#allocation2] sm:$0xf] %vm796_vm4, %v794_v61  ;;  %v4295_v61 = vld [vmem:[%s5913_s1 + $0x110] sm:$0xf] }
 0x1d7   :  { %v5231_v62 = vld [vmem:[#allocation2] sm:$0xf] }
 0x1d8   :  { %968 = vrot.lane.b32.xlu0 %v5231_v62, %s5058_s30  ;;  %813 = vrot.lane.b32.xlu1 %v5231_v62, %s5057_s29 }
 0x1d9   :  { %4632 = vmatpush3.msk.msra.mxu0 %vm45_vm1, %v5231_v62 }
 0x1da   :  { %4634 = vmatmul.mubr.msk.f32.vlgmr.msra.gmra.mxu0 %vm815_vm5, %v809_v63  ;;  %4641 = vmatprep.subr.mxu0 %v5055_v1  ;;  %v4293_v63 = vld [vmem:[%s5913_s1 + $0x100] sm:$0xff] }
 0x1db   :  { %4643 = vmatprep.mubr.msk.f32.mxu0 %vm5056_vm0, %v5055_v1 }
 0x1dc   :  { %1288 = vrot.lane.b32.xlu0 %v5231_v62, %s5063_s13  ;;  %1128 = vrot.lane.b32.xlu1 %v5231_v62, %s5060_s12 }
 0x1e0   :  { %1448 = vrot.lane.b32.xlu0 %v5231_v62, %s5065_s15  ;;  %1048 = vrot.lane.b32.xlu1 %v5231_v62, %s5059_s11 }
 0x1e4   :  { %1368 = vrot.lane.b32.xlu0 %v5231_v62, %s5064_s14  ;;  %1208 = vrot.lane.b32.xlu1 %v5231_v62, %s5061_s0 }
 0x1e8   :  { %4076 = vperm.xlu0 %5053, %v4073_v0   ;;  %v4292_v0 = vld [vmem:[%s5913_s1 + $0xf8] sm:$0xff] }
 0x1ec   :  { %4098 = vperm.xlu0 %5053, %v4095_v2   ;;  %v4291_v2 = vld [vmem:[%s5913_s1 + $0xf0] sm:$0xff] }
 0x1f0   :  { %4120 = vperm.xlu0 %5053, %v4117_v3   ;;  %v5670_v3 = vld [vmem:[%s5913_s1 + $0x138] sm:$0xf] }
 0x1f4   :  { %4142 = vperm.xlu0 %5053, %v4139_v4   ;;  %v4305_v4 = vld [vmem:[%s5913_s1 + $0x130] sm:$0xff] }
 0x24a   :  { %v969_v6 = vpop.permute.xlu0 %968  ;;  %v814_v7 = vpop.permute.xlu1 %813 }
 0x24b   :  { %4627 = vmatpush3.msk.msra.mxu1 %vm45_vm1, %v814_v7 }
 0x24c   :  { %4629 = vmatmul.mubr.msk.f32.vlgmr.msra.gmra.mxu1 %vm815_vm5, %v4194_v5  ;;  %4636 = vmatprep.subr.mxu1 %v5055_v1  ;;  %v4304_v5 = vld [vmem:[%s5913_s1 + $0x128] sm:$0xff] }
 0x24d   :  { %4637 = vmatpush3.msk.msra.mxu1 %vm45_vm1, %v969_v6  ;;  %4638 = vmatprep.mubr.msk.f32.mxu1 %vm5056_vm0, %v5055_v1 }
 0x24e   :  { %v5282_v9 = vpop.permute.xlu0 %1288  ;;  %v1129_v10 = vpop.permute.xlu1 %1128  ;;  %4646 = vmatprep.subr.mxu1 %v5055_v1 }
 0x250   :  { %4639 = vmatmul.mubr.msk.f32.vlgmr.msra.gmra.mxu1 %vm815_vm5, %v4199_v8  ;;  %v4062_v8 = vld [vmem:[%s5912_s6] sm:$0xf] }
 0x251   :  { %4647 = vmatpush3.msk.msra.mxu1 %vm45_vm1, %v1129_v10  ;;  %4648 = vmatprep.mubr.msk.f32.mxu1 %vm5056_vm0, %v5055_v1 }
 0x252   :  { %v1049_v13 = vpop.permute.xlu1 %1048  ;;  %4656 = vmatprep.subr.mxu1 %v5055_v1  ;;  %v5296_v14 = vpop.permute.xlu0 %1448  ;;  %4065 = vperm.xlu1 %5054, %v4062_v8  }
 0x253   :  { %4642 = vmatpush3.msk.msra.mxu0 %vm45_vm1, %v1049_v13 }
 0x254   :  { %4644 = vmatmul.mubr.msk.f32.vlgmr.msra.gmra.mxu0 %vm815_vm5, %v4202_v11  ;;  %4649 = vmatmul.mubr.msk.f32.vlgmr.msra.gmra.mxu1 %vm815_vm5, %v4205_v12  ;;  %v4315_v11 = vld [vmem:[%s5913_s1 + $0x150] sm:$0xff]  ;;  %v4314_v12 = vld [vmem:[%s5913_s1 + $0x148] sm:$0xff] }
 0x255   :  { %4657 = vmatpush3.msk.msra.mxu1 %vm45_vm1, %v5282_v9  ;;  %4651 = vmatprep.subr.mxu0 %v5055_v1 }
 0x256   :  { %v1209_v17 = vpop.permute.xlu1 %1208  ;;  %4653 = vmatprep.mubr.msk.f32.mxu0 %vm5056_vm0, %v5055_v1  ;;  %4658 = vmatprep.mubr.msk.f32.mxu1 %vm5056_vm0, %v5055_v1  ;;  %v1369_v18 = vpop.permute.xlu0 %1368 }
 0x257   :  { %4652 = vmatpush3.msk.msra.mxu0 %vm45_vm1, %v1209_v17  ;;  %4666 = vmatprep.subr.mxu1 %v5055_v1 }
 0x258   :  { %4654 = vmatmul.mubr.msk.f32.vlgmr.msra.gmra.mxu0 %vm815_vm5, %v4208_v15  ;;  %4659 = vmatmul.mubr.msk.f32.vlgmr.msra.gmra.mxu1 %vm815_vm5, %v4211_v16  ;;  %v4327_v15 = vld [vmem:[%s5913_s1 + $0x180] sm:$0xff]  ;;  %v4326_v16 = vld [vmem:[%s5913_s1 + $0x178] sm:$0xff] }
 0x259   :  { %4661 = vmatprep.subr.mxu0 %v5055_v1  ;;  %4667 = vmatpush3.msk.msra.mxu1 %vm45_vm1, %v5296_v14 }
 0x25a   :  { %4662 = vmatpush3.msk.msra.mxu0 %vm45_vm1, %v1369_v18  ;;  %4663 = vmatprep.mubr.msk.f32.mxu0 %vm5056_vm0, %v5055_v1 }
 0x25b   :  { %4668 = vmatprep.mubr.msk.f32.mxu1 %vm5056_vm0, %v5055_v1  ;;  %4671 = vmatprep.subr.mxu0 %v5055_v1 }
 0x25c   :  { %4676 = vmatprep.subr.mxu1 %v5055_v1  ;;  %4664 = vmatmul.mubr.msk.f32.vlgmr.msra.gmra.mxu0 %vm815_vm5, %v4214_v19  ;;  %v4084_v19 = vld [vmem:[%s5912_s6] sm:$0xf] }
 0x25d   :  { %4669 = vmatmul.mubr.msk.f32.vlgmr.msra.gmra.mxu1 %vm815_vm5, %v4217_v20  ;;  %4672 = vmatpush3.msk.msra.mxu0 %vm45_vm1, %v814_v7  ;;  %v4302_v7 = vld [vmem:[%s5913_s1 + $0x118] sm:$0xff]  ;;  %v4339_v20 = vld [vmem:[%s5913_s1 + $0x1b0] sm:$0xf] }
 0x25e   :  { %4677 = vmatpush3.msk.msra.mxu1 %vm45_vm1, %v5231_v62  ;;  %4673 = vmatprep.mubr.msk.f32.mxu0 %vm5056_vm0, %v5055_v1  ;;  %v4294_v62 = vld [vmem:[%s5913_s1 + $0x108] sm:$0xff] }
 0x25f   :  { %4678 = vmatprep.mubr.msk.f32.mxu1 %vm5056_vm0, %v5055_v1  ;;  %4681 = vmatprep.subr.mxu0 %v5055_v1 }
 0x260   :  { %4686 = vmatprep.subr.mxu1 %v5055_v1  ;;  %4674 = vmatmul.mubr.msk.f32.vlgmr.msra.gmra.mxu0 %vm815_vm5, %v4221_v21  ;;  %v4338_v21 = vld [vmem:[%s5913_s1 + $0x1a8] sm:$0xff] }
 0x261   :  { %4679 = vmatmul.mubr.msk.f32.vlgmr.msra.gmra.mxu1 %vm815_vm5, %v4220_v22  ;;  %4682 = vmatpush3.msk.msra.mxu0 %vm45_vm1, %v969_v6  ;;  %v4303_v6 = vld [vmem:[%s5913_s1 + $0x120] sm:$0xff] }
 0x262   :  { %4687 = vmatpush3.msk.msra.mxu1 %vm45_vm1, %v1049_v13  ;;  %4683 = vmatprep.mubr.msk.f32.mxu0 %vm5056_vm0, %v5055_v1  ;;  %v4313_v13 = vld [vmem:[%s5913_s1 + $0x140] sm:$0xff] }
 0x263   :  { %4688 = vmatprep.mubr.msk.f32.mxu1 %vm5056_vm0, %v5055_v1  ;;  %4691 = vmatprep.subr.mxu0 %v5055_v1  ;;  %v4337_v22 = vld [vmem:[%s5913_s1 + $0x1a0] sm:$0xff] }
 0x264   :  { %4696 = vmatprep.subr.mxu1 %v5055_v1  ;;  %4684 = vmatmul.mubr.msk.f32.vlgmr.msra.gmra.mxu0 %vm815_vm5, %v4226_v23  ;;  %v4106_v23 = vld [vmem:[%s5912_s6] sm:$0xf] }
 0x265   :  { %4689 = vmatmul.mubr.msk.f32.vlgmr.msra.gmra.mxu1 %vm815_vm5, %v4229_v24  ;;  %4692 = vmatpush3.msk.msra.mxu0 %vm45_vm1, %v1129_v10  ;;  %v4316_v10 = vld [vmem:[%s5913_s1 + $0x158] sm:$0xff] }
 0x266   :  { %4697 = vmatpush3.msk.msra.mxu1 %vm45_vm1, %v1209_v17  ;;  %4693 = vmatprep.mubr.msk.f32.mxu0 %vm5056_vm0, %v5055_v1  ;;  %v4325_v17 = vld [vmem:[%s5913_s1 + $0x170] sm:$0xff]  ;;  %v4336_v24 = vld [vmem:[%s5913_s1 + $0x198] sm:$0xff] }
 0x267   :  { %4698 = vmatprep.mubr.msk.f32.mxu1 %vm5056_vm0, %v5055_v1  ;;  %4701 = vmatprep.subr.mxu0 %v5055_v1 }
 0x268   :  { %4706 = vmatprep.subr.mxu1 %v5055_v1  ;;  %4694 = vmatmul.mubr.msk.f32.vlgmr.msra.gmra.mxu0 %vm815_vm5, %v4232_v25  ;;  %v4335_v25 = vld [vmem:[%s5913_s1 + $0x190] sm:$0xff] }
 0x269   :  { %4699 = vmatmul.mubr.msk.f32.vlgmr.msra.gmra.mxu1 %vm815_vm5, %v4235_v26  ;;  %4702 = vmatpush3.msk.msra.mxu0 %vm45_vm1, %v5282_v9  ;;  %v5723_v9 = vld [vmem:[%s5913_s1 + $0x160] sm:$0xf] }
 0x26a   :  { %4707 = vmatpush3.msk.msra.mxu1 %vm45_vm1, %v1369_v18  ;;  %4703 = vmatprep.mubr.msk.f32.mxu0 %vm5056_vm0, %v5055_v1  ;;  %v4324_v18 = vld [vmem:[%s5913_s1 + $0x168] sm:$0xff]  ;;  %v4128_v26 = vld [vmem:[%s5912_s6] sm:$0xf] }
 0x26b   :  { %4708 = vmatprep.mubr.msk.f32.mxu1 %vm5056_vm0, %v5055_v1  ;;  %4711 = vmatprep.subr.mxu0 %v5055_v1 }
 0x26c   :  { %4716 = vmatprep.subr.mxu1 %v5055_v1  ;;  %4704 = vmatmul.mubr.msk.f32.vlgmr.msra.gmra.mxu0 %vm815_vm5, %v4238_v27  ;;  %v4150_v27 = vld [vmem:[%s5912_s6] sm:$0xf] }
 0x26d   :  { %4709 = vmatmul.mubr.msk.f32.vlgmr.msra.gmra.mxu1 %vm815_vm5, %v4241_v28  ;;  %4712 = vmatpush3.msk.msra.mxu0 %vm45_vm1, %v5296_v14  ;;  %v4328_v14 = vld [vmem:[%s5913_s1 + $0x188] sm:$0xf] }
 0x26e   :  { %4717 = vmatpush3.msk.msra.mxu1 %vm45_vm1, %v808_v29  ;;  %4713 = vmatprep.mubr.msk.f32.mxu0 %vm5056_vm0, %v5055_v1 }
 0x26f   :  { %4718 = vmatprep.subr.mxu1 %v5055_v1  ;;  %4729 = vmatprep.subr.mxu0 %v5055_v1 }
 0x270   :  { %4719 = vmatpush3.msra.mxu1 %v807_v30  ;;  %4714 = vmatmul.mubr.msk.f32.vlgmr.msra.gmra.mxu0 %vm815_vm5, %v4244_v31 }
 0x271   :  { %4720 = vmatprep.subr.mxu1 %v5055_v1  ;;  %4730 = vmatpush3.msk.msra.mxu0 %vm45_vm1, %v4253_v32 }
 0x272   :  { %4721 = vmatpush3.msra.mxu1 %v806_v33  ;;  %4731 = vmatprep.subr.mxu0 %v5055_v1 }
 0x273   :  { %4722 = vmatprep.subr.mxu1 %v5055_v1  ;;  %4732 = vmatpush3.msra.mxu0 %v4252_v34 }
 0x274   :  { %4723 = vmatpush3.msra.mxu1 %v805_v35  ;;  %4733 = vmatprep.subr.mxu0 %v5055_v1 }
 0x275   :  { %4724 = vmatprep.subr.mxu1 %v5055_v1  ;;  %4726 = vmatprep.mubr.msk.f32.mxu1 %vm5056_vm0, %v5055_v1 }
 0x276   :  { %4725 = vmatpush3.msra.mxu1 %v804_v36  ;;  %4734 = vmatpush3.msra.mxu0 %v4251_v37 }
 0x277   :  { %4727 = vmatmul.mubr.msk.f32.vlgmr.msra.gmra.mxu1 %vm2208_vm6, %v5445_v38  ;;  %4735 = vmatprep.subr.mxu0 %v5055_v1 }
 0x278   :  { %4742 = vmatprep.subr.mxu1 %v5055_v1  ;;  %4736 = vmatpush3.msra.mxu0 %v4250_v39 }
 0x279   :  { %4743 = vmatpush3.msk.msra.mxu1 %vm45_vm1, %v4253_v32  ;;  %4737 = vmatprep.subr.mxu0 %v5055_v1 }
 0x27a   :  { %4744 = vmatprep.subr.mxu1 %v5055_v1  ;;  %4738 = vmatpush3.msra.mxu0 %v4249_v40 }
 0x27b   :  { %4739 = vmatprep.mubr.msk.f32.mxu0 %vm5056_vm0, %v5055_v1  ;;  %4745 = vmatpush3.msra.mxu1 %v4252_v34 }
 0x27c   :  { %4740 = vmatmul.mubr.msk.f32.vlgmr.msra.gmra.mxu0 %vm2208_vm6, %v5465_v41  ;;  %4746 = vmatprep.subr.mxu1 %v5055_v1 }
 0x27d   :  { %4755 = vmatprep.subr.mxu0 %v5055_v1  ;;  %4747 = vmatpush3.msra.mxu1 %v4251_v37 }
 0x27e   :  { %4756 = vmatpush3.msk.msra.mxu0 %vm45_vm1, %v4262_v42  ;;  %4748 = vmatprep.subr.mxu1 %v5055_v1 }
 0x27f   :  { %4757 = vmatprep.subr.mxu0 %v5055_v1  ;;  %4749 = vmatpush3.msra.mxu1 %v4250_v39 }
 0x280   :  { %4758 = vmatpush3.msra.mxu0 %v4261_v43  ;;  %4750 = vmatprep.subr.mxu1 %v5055_v1 }
 0x281   :  { %4759 = vmatprep.subr.mxu0 %v5055_v1  ;;  %4751 = vmatpush3.msra.mxu1 %v4249_v40 }
 0x282   :  { %4752 = vmatprep.mubr.msk.f32.mxu1 %vm5056_vm0, %v5055_v1  ;;  %4760 = vmatpush3.msra.mxu0 %v4260_v44 }
 0x283   :  { %4753 = vmatmul.mubr.msk.f32.vlgmr.msra.gmra.mxu1 %vm2208_vm6, %v5490_v45  ;;  %4761 = vmatprep.subr.mxu0 %v5055_v1 }
 0x284   :  { %4768 = vmatprep.subr.mxu1 %v5055_v1  ;;  %4762 = vmatpush3.msra.mxu0 %v4259_v46 }
 0x285   :  { %4769 = vmatpush3.msk.msra.mxu1 %vm45_vm1, %v4253_v32  ;;  %4763 = vmatprep.subr.mxu0 %v5055_v1 }
 0x286   :  { %4770 = vmatprep.subr.mxu1 %v5055_v1  ;;  %4764 = vmatpush3.msra.mxu0 %v4258_v47 }
 0x287   :  { %4771 = vmatpush3.msra.mxu1 %v4252_v34  ;;  %4765 = vmatprep.mubr.msk.f32.mxu0 %vm5056_vm0, %v5055_v1 }
 0x288   :  { %4772 = vmatprep.subr.mxu1 %v5055_v1  ;;  %4781 = vmatprep.subr.mxu0 %v5055_v1 }
 0x289   :  { %4766 = vmatmul.mubr.msk.f32.vlgmr.msra.gmra.mxu0 %vm2208_vm6, %v5465_v41  ;;  %4773 = vmatpush3.msra.mxu1 %v4251_v37 }
 0x28a   :  { %4782 = vmatpush3.msk.msra.mxu0 %vm45_vm1, %v4262_v42  ;;  %4774 = vmatprep.subr.mxu1 %v5055_v1 }
 0x28b   :  { %4783 = vmatprep.subr.mxu0 %v5055_v1  ;;  %4775 = vmatpush3.msra.mxu1 %v4250_v39 }
 0x28c   :  { %4784 = vmatpush3.msra.mxu0 %v4261_v43  ;;  %4776 = vmatprep.subr.mxu1 %v5055_v1 }
 0x28d   :  { %4785 = vmatprep.subr.mxu0 %v5055_v1  ;;  %4777 = vmatpush3.msra.mxu1 %v4249_v40 }
 0x28e   :  { %4786 = vmatpush3.msra.mxu0 %v4260_v44  ;;  %4778 = vmatprep.mubr.msk.f32.mxu1 %vm5056_vm0, %v5055_v1 }
 0x28f   :  { %4787 = vmatprep.subr.mxu0 %v5055_v1  ;;  %4794 = vmatprep.subr.mxu1 %v5055_v1 }
 0x290   :  { %4779 = vmatmul.mubr.msk.f32.vlgmr.msra.gmra.mxu1 %vm2208_vm6, %v5445_v38  ;;  %4788 = vmatpush3.msra.mxu0 %v4259_v46 }
 0x291   :  { %4795 = vmatpush3.msk.msra.mxu1 %vm45_vm1, %v5524_v48  ;;  %4789 = vmatprep.subr.mxu0 %v5055_v1 }
 0x292   :  { %4796 = vmatprep.subr.mxu1 %v5055_v1  ;;  %4790 = vmatpush3.msra.mxu0 %v4258_v47 }
 0x293   :  { %4791 = vmatprep.mubr.msk.f32.mxu0 %vm5056_vm0, %v5055_v1  ;;  %4797 = vmatpush3.msra.mxu1 %v4272_v49 }
 0x294   :  { %4792 = vmatmul.mubr.msk.f32.vlgmr.msra.gmra.mxu0 %vm2208_vm6, %v5490_v45  ;;  %4798 = vmatprep.subr.mxu1 %v5055_v1 }
 0x295   :  { %4807 = vmatprep.subr.mxu0 %v5055_v1  ;;  %4799 = vmatpush3.msra.mxu1 %v5540_v50 }
 0x296   :  { %4808 = vmatpush3.msk.msra.mxu0 %vm45_vm1, %v4262_v42  ;;  %4800 = vmatprep.subr.mxu1 %v5055_v1 }
 0x297   :  { %4809 = vmatprep.subr.mxu0 %v5055_v1  ;;  %4801 = vmatpush3.msra.mxu1 %v4270_v51 }
 0x298   :  { %4810 = vmatpush3.msra.mxu0 %v4261_v43  ;;  %4802 = vmatprep.subr.mxu1 %v5055_v1 }
 0x299   :  { %4811 = vmatprep.subr.mxu0 %v5055_v1  ;;  %4803 = vmatpush3.msra.mxu1 %v4269_v52 }
 0x29a   :  { %4812 = vmatpush3.msra.mxu0 %v4260_v44  ;;  %4804 = vmatprep.mubr.msk.f32.mxu1 %vm5056_vm0, %v5055_v1  ;;  %v5562_v53 = vpop.f32.mrf.mxu0 }
 0x29b   :  { %4813 = vmatprep.subr.mxu0 %v5055_v1  ;;  %4820 = vmatprep.subr.mxu1 %v5055_v1 }
 0x29c   :  { %4805 = vmatmul.mubr.msk.f32.vlgmr.msra.gmra.mxu1 %vm2208_vm6, %v5465_v41  ;;  %4814 = vmatpush3.msra.mxu0 %v4259_v46  ;;  %v4635_v54 = vpop.f32.mrf.mxu0 }
 0x29d   :  { %4821 = vmatpush3.msk.msra.mxu1 %vm45_vm1, %v5524_v48  ;;  %4815 = vmatprep.subr.mxu0 %v5055_v1 }
 0x29e   :  { %4822 = vmatprep.subr.mxu1 %v5055_v1  ;;  %4816 = vmatpush3.msra.mxu0 %v4258_v47 }
 0x29f   :  { %4817 = vmatprep.mubr.msk.f32.mxu0 %vm5056_vm0, %v5055_v1  ;;  %4823 = vmatpush3.msra.mxu1 %v4272_v49 }
 0x2a0   :  { %4818 = vmatmul.mubr.msk.f32.vlgmr.msra.gmra.mxu0 %vm2208_vm6, %v5445_v38  ;;  %4824 = vmatprep.subr.mxu1 %v5055_v1 }
 0x2a1   :  { %4833 = vmatprep.subr.mxu0 %v5055_v1  ;;  %4825 = vmatpush3.msra.mxu1 %v5540_v50 }
 0x2a2   :  { %4834 = vmatpush3.msk.msra.mxu0 %vm45_vm1, %v4284_v55  ;;  %4826 = vmatprep.subr.mxu1 %v5055_v1 }
 0x2a3   :  { %4835 = vmatprep.subr.mxu0 %v5055_v1  ;;  %4827 = vmatpush3.msra.mxu1 %v4270_v51 }
 0x2a4   :  { %4836 = vmatpush3.msra.mxu0 %v4283_v56  ;;  %4828 = vmatprep.subr.mxu1 %v5055_v1 }
 0x2a5   :  { %4837 = vmatprep.subr.mxu0 %v5055_v1  ;;  %4829 = vmatpush3.msra.mxu1 %v4269_v52 }
 0x2a6   :  { %4830 = vmatprep.mubr.msk.f32.mxu1 %vm5056_vm0, %v5055_v1  ;;  %4838 = vmatpush3.msra.mxu0 %v4282_v57 }
 0x2a7   :  { %4831 = vmatmul.mubr.msk.f32.vlgmr.msra.gmra.mxu1 %vm2208_vm6, %v5490_v45  ;;  %4839 = vmatprep.subr.mxu0 %v5055_v1 }
 0x2a8   :  { %4846 = vmatprep.subr.mxu1 %v5055_v1  ;;  %4840 = vmatpush3.msra.mxu0 %v4281_v58 }
 0x2a9   :  { %4847 = vmatpush3.msk.msra.mxu1 %vm45_vm1, %v5524_v48  ;;  %4841 = vmatprep.subr.mxu0 %v5055_v1 }
 0x2aa   :  { %4848 = vmatprep.subr.mxu1 %v5055_v1  ;;  %4842 = vmatpush3.msra.mxu0 %v4280_v59 }
 0x2ab   :  { %4849 = vmatpush3.msra.mxu1 %v4272_v49  ;;  %4843 = vmatprep.mubr.msk.f32.mxu0 %vm5056_vm0, %v5055_v1 }
 0x2ac   :  { %4850 = vmatprep.subr.mxu1 %v5055_v1  ;;  %4859 = vmatprep.subr.mxu0 %v5055_v1 }
 0x2ad   :  { %4844 = vmatmul.mubr.msk.f32.vlgmr.msra.gmra.mxu0 %vm2208_vm6, %v5465_v41  ;;  %4851 = vmatpush3.msra.mxu1 %v5540_v50 }
 0x2ae   :  { %4860 = vmatpush3.msk.msra.mxu0 %vm45_vm1, %v4284_v55  ;;  %4852 = vmatprep.subr.mxu1 %v5055_v1 }
 0x2af   :  { %4861 = vmatprep.subr.mxu0 %v5055_v1  ;;  %4853 = vmatpush3.msra.mxu1 %v4270_v51 }
 0x2b0   :  { %4862 = vmatpush3.msra.mxu0 %v4283_v56  ;;  %4854 = vmatprep.subr.mxu1 %v5055_v1 }
 0x2b1   :  { %4863 = vmatprep.subr.mxu0 %v5055_v1  ;;  %4855 = vmatpush3.msra.mxu1 %v4269_v52 }
 0x2b2   :  { %4864 = vmatpush3.msra.mxu0 %v4282_v57  ;;  %4856 = vmatprep.mubr.msk.f32.mxu1 %vm5056_vm0, %v5055_v1 }
 0x2b3   :  { %4865 = vmatprep.subr.mxu0 %v5055_v1  ;;  %4872 = vmatprep.subr.mxu1 %v5055_v1 }
 0x2b4   :  { %4857 = vmatmul.mubr.msk.f32.vlgmr.msra.gmra.mxu1 %vm2208_vm6, %v5445_v38  ;;  %4866 = vmatpush3.msra.mxu0 %v4281_v58 }
 0x2b5   :  { %4873 = vmatpush3.msk.msra.mxu1 %vm45_vm1, %v4295_v61  ;;  %4867 = vmatprep.subr.mxu0 %v5055_v1 }
 0x2b6   :  { %4874 = vmatprep.subr.mxu1 %v5055_v1  ;;  %4868 = vmatpush3.msra.mxu0 %v4280_v59 }
 0x2b7   :  { %4869 = vmatprep.mubr.msk.f32.mxu0 %vm5056_vm0, %v5055_v1  ;;  %4875 = vmatpush3.msra.mxu1 %v4294_v62 }
 0x2b8   :  { %4870 = vmatmul.mubr.msk.f32.vlgmr.msra.gmra.mxu0 %vm2208_vm6, %v5490_v45  ;;  %4876 = vmatprep.subr.mxu1 %v5055_v1 }
 0x2b9   :  { %4885 = vmatprep.subr.mxu0 %v5055_v1  ;;  %4877 = vmatpush3.msra.mxu1 %v4293_v63 }
 0x2ba   :  { %4886 = vmatpush3.msk.msra.mxu0 %vm45_vm1, %v4284_v55  ;;  %4878 = vmatprep.subr.mxu1 %v5055_v1 }
 0x2bb   :  { %4887 = vmatprep.subr.mxu0 %v5055_v1  ;;  %4879 = vmatpush3.msra.mxu1 %v4292_v0 }
 0x2bc   :  { %4888 = vmatpush3.msra.mxu0 %v4283_v56  ;;  %4880 = vmatprep.subr.mxu1 %v5055_v1 }
 0x2bd   :  { %4889 = vmatprep.subr.mxu0 %v5055_v1  ;;  %4881 = vmatpush3.msra.mxu1 %v4291_v2 }
 0x2be   :  { %4890 = vmatpush3.msra.mxu0 %v4282_v57  ;;  %4882 = vmatprep.mubr.msk.f32.mxu1 %vm5056_vm0, %v5055_v1 }
 0x2bf   :  { %4891 = vmatprep.subr.mxu0 %v5055_v1  ;;  %4898 = vmatprep.subr.mxu1 %v5055_v1 }
 0x2c0   :  { %4883 = vmatmul.mubr.msk.f32.vlgmr.msra.gmra.mxu1 %vm2208_vm6, %v5465_v41  ;;  %4892 = vmatpush3.msra.mxu0 %v4281_v58 }
 0x2c1   :  { %4899 = vmatpush3.msk.msra.mxu1 %vm45_vm1, %v4295_v61  ;;  %4893 = vmatprep.subr.mxu0 %v5055_v1 }
 0x2c2   :  { %4900 = vmatprep.subr.mxu1 %v5055_v1  ;;  %4894 = vmatpush3.msra.mxu0 %v4280_v59 }
 0x2c3   :  { %4895 = vmatprep.mubr.msk.f32.mxu0 %vm5056_vm0, %v5055_v1  ;;  %4901 = vmatpush3.msra.mxu1 %v4294_v62 }
 0x2c4   :  { %4896 = vmatmul.mubr.msk.f32.vlgmr.msra.gmra.mxu0 %vm2208_vm6, %v5445_v38  ;;  %4902 = vmatprep.subr.mxu1 %v5055_v1 }
 0x2c5   :  { %4911 = vmatprep.subr.mxu0 %v5055_v1  ;;  %4903 = vmatpush3.msra.mxu1 %v4293_v63 }
 0x2c6   :  { %4912 = vmatpush3.msk.msra.mxu0 %vm45_vm1, %v5670_v3  ;;  %4904 = vmatprep.subr.mxu1 %v5055_v1 }
 0x2c7   :  { %4913 = vmatprep.subr.mxu0 %v5055_v1  ;;  %4905 = vmatpush3.msra.mxu1 %v4292_v0 }
 0x2c8   :  { %4914 = vmatpush3.msra.mxu0 %v4305_v4  ;;  %4906 = vmatprep.subr.mxu1 %v5055_v1 }
 0x2c9   :  { %4915 = vmatprep.subr.mxu0 %v5055_v1  ;;  %4907 = vmatpush3.msra.mxu1 %v4291_v2 }
 0x2ca   :  { %4908 = vmatprep.mubr.msk.f32.mxu1 %vm5056_vm0, %v5055_v1  ;;  %4916 = vmatpush3.msra.mxu0 %v4304_v5 }
 0x2cb   :  { %4909 = vmatmul.mubr.msk.f32.vlgmr.msra.gmra.mxu1 %vm2208_vm6, %v5490_v45  ;;  %4917 = vmatprep.subr.mxu0 %v5055_v1 }
 0x2cc   :  { %4924 = vmatprep.subr.mxu1 %v5055_v1  ;;  %4918 = vmatpush3.msra.mxu0 %v4303_v6 }
 0x2cd   :  { %4925 = vmatpush3.msk.msra.mxu1 %vm45_vm1, %v4295_v61  ;;  %4919 = vmatprep.subr.mxu0 %v5055_v1 }
 0x2ce   :  { %4926 = vmatprep.subr.mxu1 %v5055_v1  ;;  %4920 = vmatpush3.msra.mxu0 %v4302_v7 }
 0x2cf   :  { %4927 = vmatpush3.msra.mxu1 %v4294_v62  ;;  %4921 = vmatprep.mubr.msk.f32.mxu0 %vm5056_vm0, %v5055_v1 }
 0x2d0   :  { %4928 = vmatprep.subr.mxu1 %v5055_v1  ;;  %4937 = vmatprep.subr.mxu0 %v5055_v1 }
 0x2d1   :  { %4922 = vmatmul.mubr.msk.f32.vlgmr.msra.gmra.mxu0 %vm2208_vm6, %v5465_v41  ;;  %4929 = vmatpush3.msra.mxu1 %v4293_v63 }
 0x2d2   :  { %4938 = vmatpush3.msk.msra.mxu0 %vm45_vm1, %v5670_v3  ;;  %4930 = vmatprep.subr.mxu1 %v5055_v1 }
 0x2d3   :  { %4939 = vmatprep.subr.mxu0 %v5055_v1  ;;  %4931 = vmatpush3.msra.mxu1 %v4292_v0 }
 0x2d4   :  { %4940 = vmatpush3.msra.mxu0 %v4305_v4  ;;  %4932 = vmatprep.subr.mxu1 %v5055_v1 }
 0x2d5   :  { %4941 = vmatprep.subr.mxu0 %v5055_v1  ;;  %4933 = vmatpush3.msra.mxu1 %v4291_v2 }
 0x2d6   :  { %4942 = vmatpush3.msra.mxu0 %v4304_v5  ;;  %4934 = vmatprep.mubr.msk.f32.mxu1 %vm5056_vm0, %v5055_v1 }
 0x2d7   :  { %4943 = vmatprep.subr.mxu0 %v5055_v1  ;;  %4950 = vmatprep.subr.mxu1 %v5055_v1 }
 0x2d8   :  { %4935 = vmatmul.mubr.msk.f32.vlgmr.msra.gmra.mxu1 %vm2208_vm6, %v5445_v38  ;;  %4944 = vmatpush3.msra.mxu0 %v4303_v6 }
 0x2d9   :  { %4951 = vmatpush3.msk.msra.mxu1 %vm45_vm1, %v5723_v9  ;;  %4945 = vmatprep.subr.mxu0 %v5055_v1 }
 0x2da   :  { %4952 = vmatprep.subr.mxu1 %v5055_v1  ;;  %4946 = vmatpush3.msra.mxu0 %v4302_v7 }
 0x2db   :  { %4947 = vmatprep.mubr.msk.f32.mxu0 %vm5056_vm0, %v5055_v1  ;;  %4953 = vmatpush3.msra.mxu1 %v4316_v10 }
 0x2dc   :  { %4948 = vmatmul.mubr.msk.f32.vlgmr.msra.gmra.mxu0 %vm2208_vm6, %v5490_v45  ;;  %4954 = vmatprep.subr.mxu1 %v5055_v1 }
 0x2dd   :  { %4963 = vmatprep.subr.mxu0 %v5055_v1  ;;  %4955 = vmatpush3.msra.mxu1 %v4315_v11 }
 0x2de   :  { %4964 = vmatpush3.msk.msra.mxu0 %vm45_vm1, %v5670_v3  ;;  %4956 = vmatprep.subr.mxu1 %v5055_v1 }
 0x2df   :  { %4965 = vmatprep.subr.mxu0 %v5055_v1  ;;  %4957 = vmatpush3.msra.mxu1 %v4314_v12 }
 0x2e0   :  { %4966 = vmatpush3.msra.mxu0 %v4305_v4  ;;  %4958 = vmatprep.subr.mxu1 %v5055_v1 }
 0x2e1   :  { %4967 = vmatprep.subr.mxu0 %v5055_v1  ;;  %4959 = vmatpush3.msra.mxu1 %v4313_v13 }
 0x2e2   :  { %4968 = vmatpush3.msra.mxu0 %v4304_v5  ;;  %4960 = vmatprep.mubr.msk.f32.mxu1 %vm5056_vm0, %v5055_v1 }
 0x2e3   :  { %4969 = vmatprep.subr.mxu0 %v5055_v1  ;;  %4976 = vmatprep.subr.mxu1 %v5055_v1 }
 0x2e4   :  { %4961 = vmatmul.mubr.msk.f32.vlgmr.msra.gmra.mxu1 %vm2208_vm6, %v5465_v41  ;;  %4970 = vmatpush3.msra.mxu0 %v4303_v6 }
 0x2e5   :  { %4977 = vmatpush3.msk.msra.mxu1 %vm45_vm1, %v5723_v9  ;;  %4971 = vmatprep.subr.mxu0 %v5055_v1 }
 0x2e6   :  { %4978 = vmatprep.subr.mxu1 %v5055_v1  ;;  %4972 = vmatpush3.msra.mxu0 %v4302_v7 }
 0x2e7   :  { %4973 = vmatprep.mubr.msk.f32.mxu0 %vm5056_vm0, %v5055_v1  ;;  %4979 = vmatpush3.msra.mxu1 %v4316_v10 }
 0x2e8   :  { %4974 = vmatmul.mubr.msk.f32.vlgmr.msra.gmra.mxu0 %vm2208_vm6, %v5445_v38  ;;  %4980 = vmatprep.subr.mxu1 %v5055_v1 }
 0x2e9   :  { %4989 = vmatprep.subr.mxu0 %v5055_v1  ;;  %4981 = vmatpush3.msra.mxu1 %v4315_v11 }
 0x2ea   :  { %4990 = vmatpush3.msk.msra.mxu0 %vm45_vm1, %v4328_v14  ;;  %4982 = vmatprep.subr.mxu1 %v5055_v1 }
 0x2eb   :  { %4991 = vmatprep.subr.mxu0 %v5055_v1  ;;  %4983 = vmatpush3.msra.mxu1 %v4314_v12 }
 0x2ec   :  { %4992 = vmatpush3.msra.mxu0 %v4327_v15  ;;  %4984 = vmatprep.subr.mxu1 %v5055_v1 }
 0x2ed   :  { %4993 = vmatprep.subr.mxu0 %v5055_v1  ;;  %4985 = vmatpush3.msra.mxu1 %v4313_v13 }
 0x2ee   :  { %4986 = vmatprep.mubr.msk.f32.mxu1 %vm5056_vm0, %v5055_v1  ;;  %4994 = vmatpush3.msra.mxu0 %v4326_v16 }
 0x2ef   :  { %4987 = vmatmul.mubr.msk.f32.vlgmr.msra.gmra.mxu1 %vm2208_vm6, %v5490_v45  ;;  %4995 = vmatprep.subr.mxu0 %v5055_v1 }
 0x2f0   :  { %5002 = vmatprep.subr.mxu1 %v5055_v1  ;;  %4996 = vmatpush3.msra.mxu0 %v4325_v17 }
 0x2f1   :  { %5003 = vmatpush3.msk.msra.mxu1 %vm45_vm1, %v5723_v9  ;;  %4997 = vmatprep.subr.mxu0 %v5055_v1 }
 0x2f2   :  { %5004 = vmatprep.subr.mxu1 %v5055_v1  ;;  %4998 = vmatpush3.msra.mxu0 %v4324_v18 }
 0x2f3   :  { %5005 = vmatpush3.msra.mxu1 %v4316_v10  ;;  %4999 = vmatprep.mubr.msk.f32.mxu0 %vm5056_vm0, %v5055_v1 }
 0x2f4   :  { %5006 = vmatprep.subr.mxu1 %v5055_v1  ;;  %5015 = vmatprep.subr.mxu0 %v5055_v1 }
 0x2f5   :  { %5000 = vmatmul.mubr.msk.f32.vlgmr.msra.gmra.mxu0 %vm2208_vm6, %v5465_v41  ;;  %5007 = vmatpush3.msra.mxu1 %v4315_v11 }
 0x2f6   :  { %5016 = vmatpush3.msk.msra.mxu0 %vm45_vm1, %v4328_v14  ;;  %5008 = vmatprep.subr.mxu1 %v5055_v1 }
 0x2f7   :  { %5017 = vmatprep.subr.mxu0 %v5055_v1  ;;  %5009 = vmatpush3.msra.mxu1 %v4314_v12 }
 0x2f8   :  { %5018 = vmatpush3.msra.mxu0 %v4327_v15  ;;  %5010 = vmatprep.subr.mxu1 %v5055_v1 }
 0x2f9   :  { %5019 = vmatprep.subr.mxu0 %v5055_v1  ;;  %5011 = vmatpush3.msra.mxu1 %v4313_v13 }
 0x2fa   :  { %5020 = vmatpush3.msra.mxu0 %v4326_v16  ;;  %5012 = vmatprep.mubr.msk.f32.mxu1 %vm5056_vm0, %v5055_v1 }
 0x2fb   :  { %5021 = vmatprep.subr.mxu0 %v5055_v1  ;;  %5028 = vmatprep.subr.mxu1 %v5055_v1 }
 0x2fc   :  { %4087 = vperm.xlu1 %5054, %v4084_v19   ;;  %5013 = vmatmul.mubr.msk.f32.vlgmr.msra.gmra.mxu1 %vm2208_vm6, %v5445_v38 }
 0x2fd   :  { %5022 = vmatpush3.msra.mxu0 %v4325_v17  ;;  %5029 = vmatpush3.msk.msra.mxu1 %vm45_vm1, %v4339_v20 }
 0x2fe   :  { %5023 = vmatprep.subr.mxu0 %v5055_v1  ;;  %5030 = vmatprep.subr.mxu1 %v5055_v1 }
 0x2ff   :  { %5024 = vmatpush3.msra.mxu0 %v4324_v18  ;;  %5025 = vmatprep.mubr.msk.f32.mxu0 %vm5056_vm0, %v5055_v1 }
 0x300   :  { %5031 = vmatpush3.msra.mxu1 %v4338_v21  ;;  %5026 = vmatmul.mubr.msk.f32.vlgmr.msra.gmra.mxu0 %vm2208_vm6, %v5490_v45 }
 0x301   :  { %5032 = vmatprep.subr.mxu1 %v5055_v1  ;;  %5038 = vmatprep.mubr.msk.f32.mxu1 %vm5056_vm0, %v5055_v1 }
 0x302   :  { %5033 = vmatpush3.msra.mxu1 %v4337_v22  ;;  %4109 = vperm.xlu1 %5054, %v4106_v23  }
 0x303   :  { %5034 = vmatprep.subr.mxu1 %v5055_v1 }
 0x304   :  { %5035 = vmatpush3.msra.mxu1 %v4336_v24 }
 0x305   :  { %5036 = vmatprep.subr.mxu1 %v5055_v1 }
 0x306   :  { %5037 = vmatpush3.msra.mxu1 %v4335_v25  ;;  %4131 = vperm.xlu1 %5054, %v4128_v26  }
 0x307   :  { %5039 = vmatmul.mubr.msk.f32.vlgmr.msra.gmra.mxu1 %vm2208_vm6, %v5490_v45 }
 0x30a   :  { %4153 = vperm.xlu1 %5054, %v4150_v27  }
 0x30c   :  { %v887_v28 = vpop.f32.mrf.mxu1 }
 0x30d   :  { %v963_v4 = vadd.f32 %v5562_v53, %v887_v28  ;;  %v4066_v28 = vpop.permute.xlu1 %4065 }
 0x30e   :  { %v4630_v29 = vpop.f32.mrf.mxu1 }
 0x310   :  { %v1041_v30 = vpop.f32.mrf.mxu1 }
 0x311   :  { %v1045_v6 = vadd.f32 %v1041_v30, %v963_v4 }
 0x312   :  { %v4640_v31 = vpop.f32.mrf.mxu1 }
 0x314   :  { %v1121_v32 = vpop.f32.mrf.mxu0  ;;  %v1201_v33 = vpop.f32.mrf.mxu1 }
 0x315   :  { %v1125_v9 = vadd.f32 %v1121_v32, %v1045_v6  ;;  %v4077_v32 = vpop.permute.xlu0 %4076 }
 0x316   :  { %v4645_v34 = vpop.f32.mrf.mxu0  ;;  %v4650_v35 = vpop.f32.mrf.mxu1 }
 0x317   :  { %v1205_v12 = vadd.f32 %v1201_v33, %v1125_v9 }
 0x318   :  { %v1281_v36 = vpop.f32.mrf.mxu0  ;;  %v1361_v1 = vpop.f32.mrf.mxu1 }
 0x319   :  { %v1285_v15 = vadd.f32 %v1281_v36, %v1205_v12 }
 0x31a   :  { %v4655_v37 = vpop.f32.mrf.mxu0  ;;  %v4660_v38 = vpop.f32.mrf.mxu1 }
 0x31b   :  { %v1365_v18 = vadd.f32 %v1361_v1, %v1285_v15 }
 0x31c   :  { %v1441_v39 = vpop.f32.mrf.mxu0 }
 0x31d   :  { %v1521_v40 = vpop.f32.mrf.mxu1  ;;  %v1445_v22 = vadd.f32 %v1441_v39, %v1365_v18 }
 0x31e   :  { %v4665_v41 = vpop.f32.mrf.mxu0 }
 0x31f   :  { %v4670_v42 = vpop.f32.mrf.mxu1  ;;  %v1525_v25 = vadd.f32 %v1521_v40, %v1445_v22 }
 0x320   :  { %v1599_v43 = vpop.f32.mrf.mxu0 }
 0x321   :  { %v1672_v44 = vpop.f32.mrf.mxu1 }
 0x322   :  { %v4675_v45 = vpop.f32.mrf.mxu0  ;;  %v1673_v62 = vadd.f32 %v1672_v44, %v1599_v43 }
 0x323   :  { %v4680_v46 = vpop.f32.mrf.mxu1 }
 0x324   :  { %v1747_v47 = vpop.f32.mrf.mxu0 }
 0x325   :  { %v1823_v48 = vpop.f32.mrf.mxu1  ;;  %v1751_v0 = vadd.f32 %v1747_v47, %v1673_v62 }
 0x326   :  { %v4685_v49 = vpop.f32.mrf.mxu0 }
 0x327   :  { %v4690_v50 = vpop.f32.mrf.mxu1  ;;  %v1827_v3 = vadd.f32 %v1823_v48, %v1751_v0 }
 0x328   :  { %v1899_v51 = vpop.f32.mrf.mxu0 }
 0x329   :  { %v1975_v52 = vpop.f32.mrf.mxu1  ;;  %v1903_v7 = vadd.f32 %v1899_v51, %v1827_v3 }
 0x32a   :  { %v4695_v54 = vpop.f32.mrf.mxu0 }
 0x32b   :  { %v4700_v55 = vpop.f32.mrf.mxu1  ;;  %v1979_v11 = vadd.f32 %v1975_v52, %v1903_v7 }
 0x32c   :  { %v2051_v56 = vpop.f32.mrf.mxu0 }
 0x32d   :  { %v2127_v57 = vpop.f32.mrf.mxu1  ;;  %v2055_v14 = vadd.f32 %v2051_v56, %v1979_v11  ;;  %v4099_v56 = vpop.permute.xlu0 %4098 }
 0x32e   :  { %v4705_v58 = vpop.f32.mrf.mxu0 }
 0x32f   :  { %v4710_v59 = vpop.f32.mrf.mxu1  ;;  %v2131_v17 = vadd.f32 %v2127_v57, %v2055_v14 }
 0x330   :  { %v2203_v61 = vpop.f32.mrf.mxu0 }
 0x331   :  { %v2207_v21 = vadd.f32 %v2203_v61, %v2131_v17 }
 0x332   :  { %v4715_v63 = vpop.f32.mrf.mxu0 }
 0x337   :  { %v2281_v2 = vpop.f32.mrf.mxu1 }
 0x338   :  { %v2282_v23 = vadd.f32 %v2281_v2, %v2207_v21 }
 0x339   :  { %v4728_v5 = vpop.f32.mrf.mxu1 }
 0x33c   :  { %v2363_v8 = vpop.f32.mrf.mxu0 }
 0x33d   :  { %v2367_v27 = vadd.f32 %v2363_v8, %v1525_v25 }
 0x33e   :  { %v4741_v10 = vpop.f32.mrf.mxu0 }
 0x343   :  { %v2437_v13 = vpop.f32.mrf.mxu1 }
 0x344   :  { %v2441_v53 = vadd.f32 %v2437_v13, %v2282_v23 }
 0x345   :  { %v4754_v16 = vpop.f32.mrf.mxu1 }
 0x346   :  { %v4068_v29 = vadd.f32 %v4066_v28, %v2441_v53 }
 0x348   :  { %v4069_v33 = vmax.f32 %v4068_v29, 0.0 }
 0x349   :  { %v2517_v19 = vpop.f32.mrf.mxu0 }
 0x34a   :  { %v4070_v36 = vadd.f32 %v4069_v33, %v5228_v60 }
 0x34b   :  { %v4767_v20 = vpop.f32.mrf.mxu0 }
 0x34c   :  { %4072 = vst.msk [vmem:[%s5915_s8] sm:$0xf] %vm4071_vm7, %v4070_v36  ;;  %v4121_v20 = vpop.permute.xlu0 %4120 }
 0x350   :  { %v2587_v24 = vpop.f32.mrf.mxu1 }
 0x351   :  { %v2588_v46 = vadd.f32 %v2587_v24, %v2517_v19 }
 0x352   :  { %v4780_v26 = vpop.f32.mrf.mxu1 }
 0x354   :  { %v2657_v30 = vpop.f32.mrf.mxu0 }
 0x355   :  { %v2661_v31 = vadd.f32 %v2657_v30, %v2367_v27 }
 0x356   :  { %v4793_v34 = vpop.f32.mrf.mxu0 }
 0x357   :  { %v4079_v35 = vadd.f32 %v4077_v32, %v2661_v31 }
 0x359   :  { %v4080_v1 = vmax.f32 %v4079_v35, 0.0 }
 0x35b   :  { %v4081_v37 = vadd.f32 %v4080_v1, %v5228_v60 }
 0x35c   :  { %v2737_v38 = vpop.f32.mrf.mxu1 }
 0x35d   :  { %4342 = vst.msk [vmem:[%s5915_s8 + $0x4] sm:$0xf] %vm4071_vm7, %v4081_v37 }
 0x35e   :  { %v4806_v39 = vpop.f32.mrf.mxu1 }
 0x360   :  { %v2807_v40 = vpop.f32.mrf.mxu0 }
 0x361   :  { %v2808_v50 = vadd.f32 %v2807_v40, %v2737_v38 }
 0x362   :  { %v4819_v41 = vpop.f32.mrf.mxu0 }
 0x367   :  { %v2877_v42 = vpop.f32.mrf.mxu1 }
 0x368   :  { %v2881_v47 = vadd.f32 %v2877_v42, %v2588_v46  ;;  %v4143_v42 = vpop.permute.xlu0 %4142 }
 0x369   :  { %v4832_v43 = vpop.f32.mrf.mxu1 }
 0x36d   :  { %v2957_v44 = vpop.f32.mrf.mxu0 }
 0x36f   :  { %v4845_v45 = vpop.f32.mrf.mxu0 }
 0x374   :  { %v3027_v48 = vpop.f32.mrf.mxu1 }
 0x375   :  { %v3028_v5 = vadd.f32 %v3027_v48, %v2957_v44 }
 0x376   :  { %v4858_v49 = vpop.f32.mrf.mxu1 }
 0x377   :  { %v4088_v51 = vpop.permute.xlu1 %4087 }
 0x378   :  { %v4090_v52 = vadd.f32 %v4088_v51, %v2881_v47  ;;  %v3097_v54 = vpop.f32.mrf.mxu0 }
 0x379   :  { %v3101_v55 = vadd.f32 %v3097_v54, %v2808_v50 }
 0x37a   :  { %v4091_v57 = vmax.f32 %v4090_v52, 0.0  ;;  %v4871_v58 = vpop.f32.mrf.mxu0 }
 0x37b   :  { %v4101_v59 = vadd.f32 %v4099_v56, %v3101_v55 }
 0x37c   :  { %v4092_v61 = vadd.f32 %v4091_v57, %v5228_v60 }
 0x37d   :  { %v4102_v62 = vmax.f32 %v4101_v59, 0.0  ;;  %v4110_v7 = vpop.permute.xlu1 %4109 }
 0x37e   :  { %4343 = vst.msk [vmem:[%s5915_s8 + $0x8] sm:$0xf] %vm4071_vm7, %v4092_v61 }
 0x37f   :  { %v4103_v63 = vadd.f32 %v4102_v62, %v5228_v60 }
 0x380   :  { %v3177_v0 = vpop.f32.mrf.mxu1 }
 0x381   :  { %4344 = vst.msk [vmem:[%s5915_s8 + $0xc] sm:$0xf] %vm4071_vm7, %v4103_v63  ;;  %v4132_v30 = vpop.permute.xlu1 %4131 }
 0x382   :  { %v4884_v2 = vpop.f32.mrf.mxu1 }
 0x384   :  { %v3247_v3 = vpop.f32.mrf.mxu0 }
 0x385   :  { %v3248_v17 = vadd.f32 %v3247_v3, %v3177_v0  ;;  %v4154_v50 = vpop.permute.xlu1 %4153 }
 0x386   :  { %v4897_v4 = vpop.f32.mrf.mxu0 }
 0x38b   :  { %v3317_v6 = vpop.f32.mrf.mxu1 }
 0x38c   :  { %v3321_v8 = vadd.f32 %v3317_v6, %v3028_v5 }
 0x38d   :  { %v4910_v9 = vpop.f32.mrf.mxu1 }
 0x38e   :  { %v4112_v10 = vadd.f32 %v4110_v7, %v3321_v8 }
 0x390   :  { %v4113_v11 = vmax.f32 %v4112_v10, 0.0 }
 0x391   :  { %v3397_v12 = vpop.f32.mrf.mxu0 }
 0x392   :  { %v4114_v13 = vadd.f32 %v4113_v11, %v5228_v60 }
 0x393   :  { %v4923_v14 = vpop.f32.mrf.mxu0 }
 0x394   :  { %4345 = vst.msk [vmem:[%s5915_s8 + $0x10] sm:$0xf] %vm4071_vm7, %v4114_v13 }
 0x398   :  { %v3467_v15 = vpop.f32.mrf.mxu1 }
 0x399   :  { %v3468_v28 = vadd.f32 %v3467_v15, %v3397_v12 }
 0x39a   :  { %v4936_v16 = vpop.f32.mrf.mxu1 }
 0x39c   :  { %v3537_v18 = vpop.f32.mrf.mxu0 }
 0x39d   :  { %v3541_v19 = vadd.f32 %v3537_v18, %v3248_v17 }
 0x39e   :  { %v4949_v21 = vpop.f32.mrf.mxu0 }
 0x39f   :  { %v4123_v22 = vadd.f32 %v4121_v20, %v3541_v19 }
 0x3a1   :  { %v4124_v23 = vmax.f32 %v4123_v22, 0.0 }
 0x3a3   :  { %v4125_v53 = vadd.f32 %v4124_v23, %v5228_v60 }
 0x3a4   :  { %v3617_v24 = vpop.f32.mrf.mxu1 }
 0x3a5   :  { %4346 = vst.msk [vmem:[%s5915_s8 + $0x14] sm:$0xf] %vm4071_vm7, %v4125_v53 }
 0x3a6   :  { %v4962_v25 = vpop.f32.mrf.mxu1 }
 0x3a8   :  { %v3687_v26 = vpop.f32.mrf.mxu0 }
 0x3a9   :  { %v3688_v39 = vadd.f32 %v3687_v26, %v3617_v24 }
 0x3aa   :  { %v4975_v27 = vpop.f32.mrf.mxu0 }
 0x3af   :  { %v3757_v29 = vpop.f32.mrf.mxu1 }
 0x3b0   :  { %v3761_v31 = vadd.f32 %v3757_v29, %v3468_v28 }
 0x3b1   :  { %v4988_v32 = vpop.f32.mrf.mxu1 }
 0x3b2   :  { %v4134_v33 = vadd.f32 %v4132_v30, %v3761_v31 }
 0x3b4   :  { %v4135_v34 = vmax.f32 %v4134_v33, 0.0 }
 0x3b5   :  { %v3837_v35 = vpop.f32.mrf.mxu0 }
 0x3b6   :  { %v4136_v36 = vadd.f32 %v4135_v34, %v5228_v60 }
 0x3b7   :  { %v5001_v1 = vpop.f32.mrf.mxu0 }
 0x3b8   :  { %4347 = vst.msk [vmem:[%s5915_s8 + $0x18] sm:$0xf] %vm4071_vm7, %v4136_v36 }
 0x3bc   :  { %v3907_v37 = vpop.f32.mrf.mxu1 }
 0x3bd   :  { %v3908_v45 = vadd.f32 %v3907_v37, %v3837_v35 }
 0x3be   :  { %v5014_v38 = vpop.f32.mrf.mxu1 }
 0x3c0   :  { %v3977_v40 = vpop.f32.mrf.mxu0 }
 0x3c1   :  { %v3981_v41 = vadd.f32 %v3977_v40, %v3688_v39 }
 0x3c2   :  { %v5027_v43 = vpop.f32.mrf.mxu0 }
 0x3c3   :  { %v4145_v44 = vadd.f32 %v4143_v42, %v3981_v41 }
 0x3c5   :  { %v4146_v46 = vmax.f32 %v4145_v44, 0.0 }
 0x3c7   :  { %v4057_v47 = vpop.f32.mrf.mxu1  ;;  %v4147_v48 = vadd.f32 %v4146_v46, %v5228_v60 }
 0x3c8   :  { %v4061_v49 = vadd.f32 %v4057_v47, %v3908_v45 }
 0x3c9   :  { %v5040_v51 = vpop.f32.mrf.mxu1  ;;  %4348 = vst.msk [vmem:[%s5915_s8 + $0x1c] sm:$0xf] %vm4071_vm7, %v4147_v48 }
 0x3ca   :  { %v4156_v52 = vadd.f32 %v4154_v50, %v4061_v49 }
 0x3cc   :  { %v4157_v54 = vmax.f32 %v4156_v52, 0.0 }
 0x3ce   :  { %v4158_v55 = vadd.f32 %v4157_v54, %v5228_v60 }
 0x3d0   :  { %4349 = vst.msk [vmem:[%s5915_s8 + $0x20] sm:$0xf] %vm4071_vm7, %v4158_v55 }

</bundles_post_ra>
